<compile_context>
chip_gen: v5e
topology: v5e:2x2
jax: 0.10.0
libtpu: 0.0.40
codegen_flags: <defaults>
</compile_context>

<pallas_src>
import functools

import jax
import jax.numpy as jnp
import numpy as np
from jax.experimental import pallas as pl
from jax.experimental.pallas import tpu as pltpu

LANE = 128
MiB = 1024 * 1024


def _round_up(n, m):
    return ((n + m - 1) // m) * m


def _cdiv(a, b):
    return -(-a // b)


def _act(x, kind):
    # NOTE: LayerNorm-padding exactness relies on the activation mapping 0 -> 0,
    # which holds for all three supported nonlinearities.
    if kind == "relu":
        return jnp.maximum(x, 0.0)
    if kind == "tanh":
        return jnp.tanh(x)
    if kind == "leaky":
        return jnp.where(x > 0, x, 0.01 * x)
    raise ValueError(f"Unknown nonlinearity: {kind}")


def _num_tensorcores():
    """Best-effort TensorCores-per-device query (v7x / megacore = 2, else 1)."""
    try:
        dev = jax.local_devices()[0]
        if dev.platform != "tpu":
            return 1
        nc = getattr(dev, "num_cores", None)
        if isinstance(nc, int) and nc >= 1:
            return nc
        kind = str(getattr(dev, "device_kind", "")).lower()
        if ("v4" in kind) or ("v5p" in kind) or ("v7" in kind) or ("7x" in kind):
            return 2
    except Exception:
        pass
    return 1


def _vmem_capacity_bytes():
    try:
        return int(pltpu.get_tpu_info().vmem_capacity_bytes)
    except Exception:
        return 64 * MiB  # conservative (v7x-sized) default


def mlp_kernel(x_ref,
               w1, b1, w2, b2, w3, b3, w4, b4, w5, b5, w6, b6,
               g_ref, be_ref,
               out_ref, lat_ref,
               *, nonlinearity, use_layer_norm, latent_size):
    """One batch tile per grid step; six matmuls (output dims padded to 128) +
    activations + LayerNorm fused.  Matmul operands use the stored weight dtype
    (bf16); accumulation / bias / activation / LayerNorm are f32."""

    def dense(h, w_ref_, b_ref_):
        w = w_ref_[...]
        return jnp.dot(h.astype(w.dtype), w,
                       preferred_element_type=jnp.float32) + b_ref_[...]

    h = _act(dense(x_ref[...], w1, b1), nonlinearity)   # bf16 cast happens in-kernel
    h = _act(dense(h, w2, b2), nonlinearity)
    lat = _act(dense(h, w3, b3), nonlinearity)

    if use_layer_norm:
        # One-pass stats.  Padded latent columns are exactly zero (padded w3/b3 cols
        # are zero and the activation maps 0 -> 0), so summing over the padded width
        # and dividing by the *logical* latent_size is exact.
        inv_n = 1.0 / float(latent_size)
        s1 = jnp.sum(lat, axis=-1, keepdims=True)
        s2 = jnp.sum(lat * lat, axis=-1, keepdims=True)
        mean = s1 * inv_n
        var = jnp.maximum(s2 * inv_n - mean * mean, 0.0)  # clamp: cancellation safety
        # Padded gamma/beta are zero, so padded latent columns stay zero after LN.
        lat = (lat - mean) * jax.lax.rsqrt(var + 1e-5) * g_ref[...] + be_ref[...]

    lat_ref[...] = lat

    h = _act(dense(lat, w4, b4), nonlinearity)
    h = _act(dense(h, w5, b5), nonlinearity)
    out_ref[...] = dense(h, w6, b6)


def init_params(key, input_size, output_size, model_size, latent_size, coord_dim):
    """PyTorch nn.Linear-style init: U(-1/sqrt(fan_in), 1/sqrt(fan_in)).
    Weights stored as (in_features, out_features); biases as (1, out_features)."""
    dims = [
        (input_size * coord_dim, model_size[0]),
        (model_size[0], model_size[1]),
        (model_size[1], latent_size),
        (latent_size, model_size[1]),
        (model_size[1], model_size[0]),
        (model_size[0], output_size * coord_dim),
    ]
    params = {}
    for i, (fin, fout) in enumerate(dims, start=1):
        key, kw, kb = jax.random.split(key, 3)
        bound = 1.0 / jnp.sqrt(fin)
        params[f"w{i}"] = jax.random.uniform(kw, (fin, fout), jnp.float32, -bound, bound)
        params[f"b{i}"] = jax.random.uniform(kb, (1, fout), jnp.float32, -bound, bound)
    params["ln_gamma"] = jnp.ones((1, latent_size), jnp.float32)
    params["ln_beta"] = jnp.zeros((1, latent_size), jnp.float32)
    return params


def _pad2(a, rows, cols):
    r, c = a.shape
    return jnp.pad(a, ((0, rows - r), (0, cols - c)))


def mlp_forward(x, params, *, output_size, coord_dim, nonlinearity, use_layer_norm,
                batch_tile=None, matmul_dtype=jnp.bfloat16):
    B = x.shape[0]
    xf = x.reshape(B, -1).astype(jnp.float32)
    in_feat = xf.shape[1]
    d1 = params["w1"].shape[1]
    d2 = params["w2"].shape[1]
    latent_size = params["w3"].shape[1]
    out_feat = params["w6"].shape[1]
    assert out_feat == output_size * coord_dim

    # --- pad only output (N) feature dims to multiples of 128 (lane-dense matmuls
    # and stores).  w1 keeps K = in_feat rows; x is passed unpadded. ---
    d1_p = _round_up(d1, LANE)
    d2_p = _round_up(d2, LANE)
    lat_p = _round_up(latent_size, LANE)
    out_p = _round_up(out_feat, LANE)
    pad_dims = [(in_feat, d1_p), (d1_p, d2_p), (d2_p, lat_p),
                (lat_p, d2_p), (d2_p, d1_p), (d1_p, out_p)]

    flat_params = []
    for i, (rp, cp) in enumerate(pad_dims, start=1):
        flat_params.append(_pad2(params[f"w{i}"], rp, cp).astype(matmul_dtype))
        flat_params.append(_pad2(params[f"b{i}"], 1, cp).astype(jnp.float32))
    flat_params.append(_pad2(params["ln_gamma"], 1, lat_p).astype(jnp.float32))
    flat_params.append(_pad2(params["ln_beta"], 1, lat_p).astype(jnp.float32))
    param_bytes = sum(int(np.prod(p.shape)) * p.dtype.itemsize for p in flat_params)

    # --- VMEM-budget & core-count aware batch tiling ---
    num_cores = _num_tensorcores()
    vmem_cap = _vmem_capacity_bytes()
    # ~40 MiB usable on v7x (64 MiB), ~96-104 MiB on v5e/v6e (128 MiB).
    budget = max(16 * MiB, min(vmem_cap - 24 * MiB, (3 * vmem_cap) // 4))

    per_row = (2 * in_feat * 4                    # x tile, f32, double-buffered
               + 2 * (out_p + lat_p) * 4          # out/lat tiles, f32, double-buffered
               + 4 * (d1_p + d2_p + lat_p))       # live f32 intermediates (upper bound)
    fixed_bytes = 2 * param_bytes                 # conservative (double-buffer fallback)
    bt_cap = max(16, ((budget - fixed_bytes) // per_row) // 16 * 16)
    bt_cap = min(bt_cap, 4096)

    b_aligned = _round_up(B, 16)                  # 16-row alignment (bf16 sublane pack)
    if batch_tile is not None:
        bt = min(_round_up(batch_tile, 16), bt_cap)
    elif num_cores > 1 and b_aligned >= 16 * num_cores:
        # give every TensorCore at least one tile
        bt = min(bt_cap, _round_up(_cdiv(b_aligned, num_cores), 16))
    else:
        # single-TC chips: never split a batch that fits one tile
        bt = min(bt_cap, b_aligned)
    bt = max(bt, 16)

    steps = _cdiv(b_aligned, bt)
    if num_cores > 1 and steps > 1 and steps % num_cores != 0:
        # keep the two TensorCores balanced on v7x
        steps = _cdiv(steps, num_cores) * num_cores
        bt = max(16, _round_up(_cdiv(b_aligned, steps), 16))
        steps = _cdiv(b_aligned, bt)
    B_pad = steps * bt
    grid = (steps,)

    vmem_est = per_row * bt + fixed_bytes
    assert vmem_est <= budget + 8 * MiB, (
        f"batch_tile={bt} needs ~{vmem_est // MiB} MiB VMEM, over the "
        f"{budget // MiB} MiB budget for this TPU generation; reduce batch_tile")
    vmem_limit = min(max(vmem_est + 4 * MiB, 32 * MiB), budget + 8 * MiB)

    # --- x passed straight through (f32, unpadded features); pad rows only if needed ---
    x_in = xf if B_pad == B else jnp.pad(xf, ((0, B_pad - B), (0, 0)))

    def row_spec(f):
        return pl.BlockSpec((bt, f), lambda i: (i, 0))

    x_spec = pl.BlockSpec((bt, in_feat), lambda i: (i, 0))

    kernel = functools.partial(
        mlp_kernel, nonlinearity=nonlinearity, use_layer_norm=use_layer_norm,
        latent_size=latent_size)

    # --- advisory cost estimate for XLA's scheduler ---
    flops = B_pad * sum(2 * rp * cp for rp, cp in pad_dims)
    transcendentals = (B_pad * (d1_p + d2_p + lat_p + d2_p + d1_p)
                       if nonlinearity == "tanh" else 0)
    bytes_accessed = (x_in.size * 4 + param_bytes + B_pad * (out_p + lat_p) * 4)
    cost = pl.CostEstimate(flops=int(flops), transcendentals=int(transcendentals),
                           bytes_accessed=int(bytes_accessed))
    compiler_params = pltpu.CompilerParams(
        dimension_semantics=("parallel",),
        vmem_limit_bytes=int(vmem_limit))

    def _build(single_buffer_consts):
        if single_buffer_consts:
            # constant blocks never change across the grid -> no need to double-buffer
            def const_spec(shape):
                return pl.BlockSpec(shape, lambda i: (0, 0),
                                    pipeline_mode=pl.Buffered(1))
        else:
            def const_spec(shape):
                return pl.BlockSpec(shape, lambda i: (0, 0))
        return pl.pallas_call(
            kernel,
            grid=grid,
            in_specs=[x_spec] + [const_spec(p.shape) for p in flat_params],
            out_specs=(row_spec(out_p), row_spec(lat_p)),
            out_shape=(jax.ShapeDtypeStruct((B_pad, out_p), jnp.float32),
                       jax.ShapeDtypeStruct((B_pad, lat_p), jnp.float32)),
            compiler_params=compiler_params,
            cost_estimate=cost,
        )

    try:
        out_flat, latents = _build(True)(x_in, *flat_params)
    except Exception:
        # fall back to default double-buffered constant blocks
        out_flat, latents = _build(False)(x_in, *flat_params)

    out = out_flat[:B, :out_feat].reshape(B, output_size, coord_dim)
    return out, latents[:B, :latent_size]


def mlp_reference(x, params, *, output_size, coord_dim, nonlinearity, use_layer_norm,
                  matmul_dtype=jnp.bfloat16):
    """Pure-JAX reference mirroring the kernel numerics (bf16 matmul operands,
    f32 accumulation / elementwise)."""
    B = x.shape[0]
    h = x.reshape(B, -1).astype(jnp.float32)

    def dense(h_, w, b):
        return jnp.dot(h_.astype(matmul_dtype), w.astype(matmul_dtype),
                       preferred_element_type=jnp.float32) + b

    h = _act(dense(h, params["w1"], params["b1"]), nonlinearity)
    h = _act(dense(h, params["w2"], params["b2"]), nonlinearity)
    lat = _act(dense(h, params["w3"], params["b3"]), nonlinearity)
    if use_layer_norm:
        mean = jnp.mean(lat, axis=-1, keepdims=True)
        var = jnp.mean((lat - mean) ** 2, axis=-1, keepdims=True)
        lat = (lat - mean) * jax.lax.rsqrt(var + 1e-5) * params["ln_gamma"] + params["ln_beta"]
    h = _act(dense(lat, params["w4"], params["b4"]), nonlinearity)
    h = _act(dense(h, params["w5"], params["b5"]), nonlinearity)
    out = dense(h, params["w6"], params["b6"])
    return out.reshape(B, output_size, coord_dim), lat


if __name__ == "__main__":
    input_size = 8
    output_size = 8
    coord_dim = 2
    model_size = (32, 64)
    latent_size = 16
    nonlinearity = "relu"
    use_layer_norm = True
    batch = 16

    key = jax.random.PRNGKey(0)
    key, kp, kx = jax.random.split(key, 3)
    params = init_params(kp, input_size, output_size, model_size, latent_size, coord_dim)
    x = jax.random.normal(kx, (batch, input_size, coord_dim), jnp.float32)

    out, latents = mlp_forward(
        x, params,
        output_size=output_size, coord_dim=coord_dim,
        nonlinearity=nonlinearity, use_layer_norm=use_layer_norm)
    jax.block_until_ready((out, latents))

    ref_out, ref_lat = mlp_reference(
        x, params,
        output_size=output_size, coord_dim=coord_dim,
        nonlinearity=nonlinearity, use_layer_norm=use_layer_norm)
    jax.block_until_ready((ref_out, ref_lat))

    assert out.shape == (batch, output_size, coord_dim)
    assert latents.shape == (batch, latent_size)
    assert np.allclose(np.asarray(out), np.asarray(ref_out), atol=5e-3, rtol=5e-3)
    assert np.allclose(np.asarray(latents), np.asarray(ref_lat), atol=5e-3, rtol=5e-3)
    print("KERNEL_OK")
</pallas_src>

<mosaic_0001>
module attributes {stable_mosaic.version = 11 : i64} {
  func.func @mlp_kernel(%arg0: i32, %arg1: memref<16x16xf32, #tpu.memory_space<vmem>>, %arg2: memref<16x128xbf16, #tpu.memory_space<vmem>>, %arg3: memref<1x128xf32, #tpu.memory_space<vmem>>, %arg4: memref<128x128xbf16, #tpu.memory_space<vmem>>, %arg5: memref<1x128xf32, #tpu.memory_space<vmem>>, %arg6: memref<128x128xbf16, #tpu.memory_space<vmem>>, %arg7: memref<1x128xf32, #tpu.memory_space<vmem>>, %arg8: memref<128x128xbf16, #tpu.memory_space<vmem>>, %arg9: memref<1x128xf32, #tpu.memory_space<vmem>>, %arg10: memref<128x128xbf16, #tpu.memory_space<vmem>>, %arg11: memref<1x128xf32, #tpu.memory_space<vmem>>, %arg12: memref<128x128xbf16, #tpu.memory_space<vmem>>, %arg13: memref<1x128xf32, #tpu.memory_space<vmem>>, %arg14: memref<1x128xf32, #tpu.memory_space<vmem>>, %arg15: memref<1x128xf32, #tpu.memory_space<vmem>>, %arg16: memref<16x128xf32, #tpu.memory_space<vmem>>, %arg17: memref<16x128xf32, #tpu.memory_space<vmem>>) attributes {dimension_semantics = [#tpu.dimension_semantics<parallel>], iteration_bounds = array<i64: 1>, scalar_prefetch = 0 : i64, scratch_operands = 0 : i64, tpu.core_type = #tpu.core_type<tc>, window_params = [{transform_indices = @transform_0, window_bounds = array<i64: 16, 16>}, {pipeline_mode = #tpu.pipeline_mode<synchronous>, transform_indices = @transform_1, window_bounds = array<i64: 16, 128>}, {pipeline_mode = #tpu.pipeline_mode<synchronous>, transform_indices = @transform_2, window_bounds = array<i64: 1, 128>}, {pipeline_mode = #tpu.pipeline_mode<synchronous>, transform_indices = @transform_3, window_bounds = array<i64: 128, 128>}, {pipeline_mode = #tpu.pipeline_mode<synchronous>, transform_indices = @transform_4, window_bounds = array<i64: 1, 128>}, {pipeline_mode = #tpu.pipeline_mode<synchronous>, transform_indices = @transform_5, window_bounds = array<i64: 128, 128>}, {pipeline_mode = #tpu.pipeline_mode<synchronous>, transform_indices = @transform_6, window_bounds = array<i64: 1, 128>}, {pipeline_mode = #tpu.pipeline_mode<synchronous>, transform_indices = @transform_7, window_bounds = array<i64: 128, 128>}, {pipeline_mode = #tpu.pipeline_mode<synchronous>, transform_indices = @transform_8, window_bounds = array<i64: 1, 128>}, {pipeline_mode = #tpu.pipeline_mode<synchronous>, transform_indices = @transform_9, window_bounds = array<i64: 128, 128>}, {pipeline_mode = #tpu.pipeline_mode<synchronous>, transform_indices = @transform_10, window_bounds = array<i64: 1, 128>}, {pipeline_mode = #tpu.pipeline_mode<synchronous>, transform_indices = @transform_11, window_bounds = array<i64: 128, 128>}, {pipeline_mode = #tpu.pipeline_mode<synchronous>, transform_indices = @transform_12, window_bounds = array<i64: 1, 128>}, {pipeline_mode = #tpu.pipeline_mode<synchronous>, transform_indices = @transform_13, window_bounds = array<i64: 1, 128>}, {pipeline_mode = #tpu.pipeline_mode<synchronous>, transform_indices = @transform_14, window_bounds = array<i64: 1, 128>}, {transform_indices = @transform_15, window_bounds = array<i64: 16, 128>}, {transform_indices = @transform_16, window_bounds = array<i64: 16, 128>}]} {
    %c0 = arith.constant 0 : index
    %c0_0 = arith.constant 0 : index
    %0 = vector.load %arg1[%c0, %c0_0] : memref<16x16xf32, #tpu.memory_space<vmem>>, vector<16x16xf32>
    %c0_1 = arith.constant 0 : index
    %c0_2 = arith.constant 0 : index
    %1 = vector.load %arg2[%c0_1, %c0_2] : memref<16x128xbf16, #tpu.memory_space<vmem>>, vector<16x128xbf16>
    %2 = arith.truncf %0 : vector<16x16xf32> to vector<16x16xbf16>
    %cst = arith.constant dense<0.000000e+00> : vector<16x128xf32>
    %3 = tpu.matmul %2, %1, %cst {dimension_numbers = #tpu.dot_dimension_numbers<[1], [0], [0], [1], [0, 0, 1, 1], [], []>} : vector<16x16xbf16>, vector<16x128xbf16>, vector<16x128xf32> -> vector<16x128xf32>
    %c0_3 = arith.constant 0 : index
    %c0_4 = arith.constant 0 : index
    %4 = vector.load %arg3[%c0_3, %c0_4] : memref<1x128xf32, #tpu.memory_space<vmem>>, vector<1x128xf32>
    %5 = vector.broadcast %4 : vector<1x128xf32> to vector<16x128xf32>
    %6 = arith.addf %3, %5 : vector<16x128xf32>
    %cst_5 = arith.constant 0.000000e+00 : f32
    %7 = vector.broadcast %cst_5 : f32 to vector<16x128xf32>
    %8 = arith.maximumf %6, %7 : vector<16x128xf32>
    %c0_6 = arith.constant 0 : index
    %c0_7 = arith.constant 0 : index
    %9 = vector.load %arg4[%c0_6, %c0_7] : memref<128x128xbf16, #tpu.memory_space<vmem>>, vector<128x128xbf16>
    %10 = arith.truncf %8 : vector<16x128xf32> to vector<16x128xbf16>
    %cst_8 = arith.constant dense<0.000000e+00> : vector<16x128xf32>
    %11 = tpu.matmul %10, %9, %cst_8 {dimension_numbers = #tpu.dot_dimension_numbers<[1], [0], [0], [1], [0, 0, 1, 1], [], []>} : vector<16x128xbf16>, vector<128x128xbf16>, vector<16x128xf32> -> vector<16x128xf32>
    %c0_9 = arith.constant 0 : index
    %c0_10 = arith.constant 0 : index
    %12 = vector.load %arg5[%c0_9, %c0_10] : memref<1x128xf32, #tpu.memory_space<vmem>>, vector<1x128xf32>
    %13 = vector.broadcast %12 : vector<1x128xf32> to vector<16x128xf32>
    %14 = arith.addf %11, %13 : vector<16x128xf32>
    %cst_11 = arith.constant 0.000000e+00 : f32
    %15 = vector.broadcast %cst_11 : f32 to vector<16x128xf32>
    %16 = arith.maximumf %14, %15 : vector<16x128xf32>
    %c0_12 = arith.constant 0 : index
    %c0_13 = arith.constant 0 : index
    %17 = vector.load %arg6[%c0_12, %c0_13] : memref<128x128xbf16, #tpu.memory_space<vmem>>, vector<128x128xbf16>
    %18 = arith.truncf %16 : vector<16x128xf32> to vector<16x128xbf16>
    %cst_14 = arith.constant dense<0.000000e+00> : vector<16x128xf32>
    %19 = tpu.matmul %18, %17, %cst_14 {dimension_numbers = #tpu.dot_dimension_numbers<[1], [0], [0], [1], [0, 0, 1, 1], [], []>} : vector<16x128xbf16>, vector<128x128xbf16>, vector<16x128xf32> -> vector<16x128xf32>
    %c0_15 = arith.constant 0 : index
    %c0_16 = arith.constant 0 : index
    %20 = vector.load %arg7[%c0_15, %c0_16] : memref<1x128xf32, #tpu.memory_space<vmem>>, vector<1x128xf32>
    %21 = vector.broadcast %20 : vector<1x128xf32> to vector<16x128xf32>
    %22 = arith.addf %19, %21 : vector<16x128xf32>
    %cst_17 = arith.constant 0.000000e+00 : f32
    %23 = vector.broadcast %cst_17 : f32 to vector<16x128xf32>
    %24 = arith.maximumf %22, %23 : vector<16x128xf32>
    %cst_18 = arith.constant dense<0.000000e+00> : vector<16xf32>
    %25 = vector.multi_reduction <add>, %24, %cst_18 [1] : vector<16x128xf32> to vector<16xf32>
    %26 = vector.shape_cast %25 : vector<16xf32> to vector<16x1xf32>
    %27 = arith.mulf %24, %24 : vector<16x128xf32>
    %cst_19 = arith.constant dense<0.000000e+00> : vector<16xf32>
    %28 = vector.multi_reduction <add>, %27, %cst_19 [1] : vector<16x128xf32> to vector<16xf32>
    %29 = vector.shape_cast %28 : vector<16xf32> to vector<16x1xf32>
    %cst_20 = arith.constant 6.250000e-02 : f32
    %30 = vector.broadcast %cst_20 : f32 to vector<16x1xf32>
    %31 = arith.mulf %26, %30 : vector<16x1xf32>
    %cst_21 = arith.constant 6.250000e-02 : f32
    %32 = vector.broadcast %cst_21 : f32 to vector<16x1xf32>
    %33 = arith.mulf %29, %32 : vector<16x1xf32>
    %34 = arith.mulf %31, %31 : vector<16x1xf32>
    %35 = arith.subf %33, %34 : vector<16x1xf32>
    %cst_22 = arith.constant 0.000000e+00 : f32
    %36 = vector.broadcast %cst_22 : f32 to vector<16x1xf32>
    %37 = arith.maximumf %35, %36 : vector<16x1xf32>
    %38 = vector.broadcast %31 : vector<16x1xf32> to vector<16x128xf32>
    %39 = arith.subf %24, %38 : vector<16x128xf32>
    %cst_23 = arith.constant 9.99999974E-6 : f32
    %40 = vector.broadcast %cst_23 : f32 to vector<16x1xf32>
    %41 = arith.addf %37, %40 : vector<16x1xf32>
    %42 = math.rsqrt %41 : vector<16x1xf32>
    %43 = vector.broadcast %42 : vector<16x1xf32> to vector<16x128xf32>
    %44 = arith.mulf %39, %43 : vector<16x128xf32>
    %c0_24 = arith.constant 0 : index
    %c0_25 = arith.constant 0 : index
    %45 = vector.load %arg14[%c0_24, %c0_25] : memref<1x128xf32, #tpu.memory_space<vmem>>, vector<1x128xf32>
    %46 = vector.broadcast %45 : vector<1x128xf32> to vector<16x128xf32>
    %47 = arith.mulf %44, %46 : vector<16x128xf32>
    %c0_26 = arith.constant 0 : index
    %c0_27 = arith.constant 0 : index
    %48 = vector.load %arg15[%c0_26, %c0_27] : memref<1x128xf32, #tpu.memory_space<vmem>>, vector<1x128xf32>
    %49 = vector.broadcast %48 : vector<1x128xf32> to vector<16x128xf32>
    %50 = arith.addf %47, %49 : vector<16x128xf32>
    %c0_28 = arith.constant 0 : index
    %c0_29 = arith.constant 0 : index
    %51 = vector.load %arg17[%c0_28, %c0_29] : memref<16x128xf32, #tpu.memory_space<vmem>>, vector<16x128xf32>
    tpu.vector_store %arg17[%c0_28, %c0_29], %50 {strides = array<i32>} : memref<16x128xf32, #tpu.memory_space<vmem>>, vector<16x128xf32>,
    %c0_30 = arith.constant 0 : index
    %c0_31 = arith.constant 0 : index
    %52 = vector.load %arg8[%c0_30, %c0_31] : memref<128x128xbf16, #tpu.memory_space<vmem>>, vector<128x128xbf16>
    %53 = arith.truncf %50 : vector<16x128xf32> to vector<16x128xbf16>
    %cst_32 = arith.constant dense<0.000000e+00> : vector<16x128xf32>
    %54 = tpu.matmul %53, %52, %cst_32 {dimension_numbers = #tpu.dot_dimension_numbers<[1], [0], [0], [1], [0, 0, 1, 1], [], []>} : vector<16x128xbf16>, vector<128x128xbf16>, vector<16x128xf32> -> vector<16x128xf32>
    %c0_33 = arith.constant 0 : index
    %c0_34 = arith.constant 0 : index
    %55 = vector.load %arg9[%c0_33, %c0_34] : memref<1x128xf32, #tpu.memory_space<vmem>>, vector<1x128xf32>
    %56 = vector.broadcast %55 : vector<1x128xf32> to vector<16x128xf32>
    %57 = arith.addf %54, %56 : vector<16x128xf32>
    %cst_35 = arith.constant 0.000000e+00 : f32
    %58 = vector.broadcast %cst_35 : f32 to vector<16x128xf32>
    %59 = arith.maximumf %57, %58 : vector<16x128xf32>
    %c0_36 = arith.constant 0 : index
    %c0_37 = arith.constant 0 : index
    %60 = vector.load %arg10[%c0_36, %c0_37] : memref<128x128xbf16, #tpu.memory_space<vmem>>, vector<128x128xbf16>
    %61 = arith.truncf %59 : vector<16x128xf32> to vector<16x128xbf16>
    %cst_38 = arith.constant dense<0.000000e+00> : vector<16x128xf32>
    %62 = tpu.matmul %61, %60, %cst_38 {dimension_numbers = #tpu.dot_dimension_numbers<[1], [0], [0], [1], [0, 0, 1, 1], [], []>} : vector<16x128xbf16>, vector<128x128xbf16>, vector<16x128xf32> -> vector<16x128xf32>
    %c0_39 = arith.constant 0 : index
    %c0_40 = arith.constant 0 : index
    %63 = vector.load %arg11[%c0_39, %c0_40] : memref<1x128xf32, #tpu.memory_space<vmem>>, vector<1x128xf32>
    %64 = vector.broadcast %63 : vector<1x128xf32> to vector<16x128xf32>
    %65 = arith.addf %62, %64 : vector<16x128xf32>
    %cst_41 = arith.constant 0.000000e+00 : f32
    %66 = vector.broadcast %cst_41 : f32 to vector<16x128xf32>
    %67 = arith.maximumf %65, %66 : vector<16x128xf32>
    %c0_42 = arith.constant 0 : index
    %c0_43 = arith.constant 0 : index
    %68 = vector.load %arg12[%c0_42, %c0_43] : memref<128x128xbf16, #tpu.memory_space<vmem>>, vector<128x128xbf16>
    %69 = arith.truncf %67 : vector<16x128xf32> to vector<16x128xbf16>
    %cst_44 = arith.constant dense<0.000000e+00> : vector<16x128xf32>
    %70 = tpu.matmul %69, %68, %cst_44 {dimension_numbers = #tpu.dot_dimension_numbers<[1], [0], [0], [1], [0, 0, 1, 1], [], []>} : vector<16x128xbf16>, vector<128x128xbf16>, vector<16x128xf32> -> vector<16x128xf32>
    %c0_45 = arith.constant 0 : index
    %c0_46 = arith.constant 0 : index
    %71 = vector.load %arg13[%c0_45, %c0_46] : memref<1x128xf32, #tpu.memory_space<vmem>>, vector<1x128xf32>
    %72 = vector.broadcast %71 : vector<1x128xf32> to vector<16x128xf32>
    %73 = arith.addf %70, %72 : vector<16x128xf32>
    %c0_47 = arith.constant 0 : index
    %c0_48 = arith.constant 0 : index
    %74 = vector.load %arg16[%c0_47, %c0_48] : memref<16x128xf32, #tpu.memory_space<vmem>>, vector<16x128xf32>
    tpu.vector_store %arg16[%c0_47, %c0_48], %73 {strides = array<i32>} : memref<16x128xf32, #tpu.memory_space<vmem>>, vector<16x128xf32>,
    return
  }
  func.func @transform_0(%arg0: i32) -> (i32, i32) {
    %c0_i32 = arith.constant 0 : i32
    %c0_i32_0 = arith.constant 0 : i32
    return %arg0, %c0_i32 : i32, i32
  }
  func.func @transform_1(%arg0: i32) -> (i32, i32) {
    %c0_i32 = arith.constant 0 : i32
    %c0_i32_0 = arith.constant 0 : i32
    %c0_i32_1 = arith.constant 0 : i32
    return %c0_i32, %c0_i32_0 : i32, i32
  }
  func.func @transform_2(%arg0: i32) -> (i32, i32) {
    %c0_i32 = arith.constant 0 : i32
    %c0_i32_0 = arith.constant 0 : i32
    %c0_i32_1 = arith.constant 0 : i32
    return %c0_i32, %c0_i32_0 : i32, i32
  }
  func.func @transform_3(%arg0: i32) -> (i32, i32) {
    %c0_i32 = arith.constant 0 : i32
    %c0_i32_0 = arith.constant 0 : i32
    %c0_i32_1 = arith.constant 0 : i32
    return %c0_i32, %c0_i32_0 : i32, i32
  }
  func.func @transform_4(%arg0: i32) -> (i32, i32) {
    %c0_i32 = arith.constant 0 : i32
    %c0_i32_0 = arith.constant 0 : i32
    %c0_i32_1 = arith.constant 0 : i32
    return %c0_i32, %c0_i32_0 : i32, i32
  }
  func.func @transform_5(%arg0: i32) -> (i32, i32) {
    %c0_i32 = arith.constant 0 : i32
    %c0_i32_0 = arith.constant 0 : i32
    %c0_i32_1 = arith.constant 0 : i32
    return %c0_i32, %c0_i32_0 : i32, i32
  }
  func.func @transform_6(%arg0: i32) -> (i32, i32) {
    %c0_i32 = arith.constant 0 : i32
    %c0_i32_0 = arith.constant 0 : i32
    %c0_i32_1 = arith.constant 0 : i32
    return %c0_i32, %c0_i32_0 : i32, i32
  }
  func.func @transform_7(%arg0: i32) -> (i32, i32) {
    %c0_i32 = arith.constant 0 : i32
    %c0_i32_0 = arith.constant 0 : i32
    %c0_i32_1 = arith.constant 0 : i32
    return %c0_i32, %c0_i32_0 : i32, i32
  }
  func.func @transform_8(%arg0: i32) -> (i32, i32) {
    %c0_i32 = arith.constant 0 : i32
    %c0_i32_0 = arith.constant 0 : i32
    %c0_i32_1 = arith.constant 0 : i32
    return %c0_i32, %c0_i32_0 : i32, i32
  }
  func.func @transform_9(%arg0: i32) -> (i32, i32) {
    %c0_i32 = arith.constant 0 : i32
    %c0_i32_0 = arith.constant 0 : i32
    %c0_i32_1 = arith.constant 0 : i32
    return %c0_i32, %c0_i32_0 : i32, i32
  }
  func.func @transform_10(%arg0: i32) -> (i32, i32) {
    %c0_i32 = arith.constant 0 : i32
    %c0_i32_0 = arith.constant 0 : i32
    %c0_i32_1 = arith.constant 0 : i32
    return %c0_i32, %c0_i32_0 : i32, i32
  }
  func.func @transform_11(%arg0: i32) -> (i32, i32) {
    %c0_i32 = arith.constant 0 : i32
    %c0_i32_0 = arith.constant 0 : i32
    %c0_i32_1 = arith.constant 0 : i32
    return %c0_i32, %c0_i32_0 : i32, i32
  }
  func.func @transform_12(%arg0: i32) -> (i32, i32) {
    %c0_i32 = arith.constant 0 : i32
    %c0_i32_0 = arith.constant 0 : i32
    %c0_i32_1 = arith.constant 0 : i32
    return %c0_i32, %c0_i32_0 : i32, i32
  }
  func.func @transform_13(%arg0: i32) -> (i32, i32) {
    %c0_i32 = arith.constant 0 : i32
    %c0_i32_0 = arith.constant 0 : i32
    %c0_i32_1 = arith.constant 0 : i32
    return %c0_i32, %c0_i32_0 : i32, i32
  }
  func.func @transform_14(%arg0: i32) -> (i32, i32) {
    %c0_i32 = arith.constant 0 : i32
    %c0_i32_0 = arith.constant 0 : i32
    %c0_i32_1 = arith.constant 0 : i32
    return %c0_i32, %c0_i32_0 : i32, i32
  }
  func.func @transform_15(%arg0: i32) -> (i32, i32) {
    %c0_i32 = arith.constant 0 : i32
    %c0_i32_0 = arith.constant 0 : i32
    return %arg0, %c0_i32 : i32, i32
  }
  func.func @transform_16(%arg0: i32) -> (i32, i32) {
    %c0_i32 = arith.constant 0 : i32
    %c0_i32_0 = arith.constant 0 : i32
    return %arg0, %c0_i32 : i32, i32
  }
}

module attributes {stable_mosaic.version = 11 : i64} {
  func.func @mlp_kernel(%arg0: i32, %arg1: memref<16x16xf32, #tpu.memory_space<vmem>>, %arg2: memref<16x128xbf16, #tpu.memory_space<vmem>>, %arg3: memref<1x128xf32, #tpu.memory_space<vmem>>, %arg4: memref<128x128xbf16, #tpu.memory_space<vmem>>, %arg5: memref<1x128xf32, #tpu.memory_space<vmem>>, %arg6: memref<128x128xbf16, #tpu.memory_space<vmem>>, %arg7: memref<1x128xf32, #tpu.memory_space<vmem>>, %arg8: memref<128x128xbf16, #tpu.memory_space<vmem>>, %arg9: memref<1x128xf32, #tpu.memory_space<vmem>>, %arg10: memref<128x128xbf16, #tpu.memory_space<vmem>>, %arg11: memref<1x128xf32, #tpu.memory_space<vmem>>, %arg12: memref<128x128xbf16, #tpu.memory_space<vmem>>, %arg13: memref<1x128xf32, #tpu.memory_space<vmem>>, %arg14: memref<1x128xf32, #tpu.memory_space<vmem>>, %arg15: memref<1x128xf32, #tpu.memory_space<vmem>>, %arg16: memref<16x128xf32, #tpu.memory_space<vmem>>, %arg17: memref<16x128xf32, #tpu.memory_space<vmem>>) attributes {dimension_semantics = [#tpu.dimension_semantics<parallel>], iteration_bounds = array<i64: 1>, scalar_prefetch = 0 : i64, scratch_operands = 0 : i64, tpu.core_type = #tpu.core_type<tc>, window_params = [{transform_indices = @transform_0, window_bounds = array<i64: 16, 16>}, {pipeline_mode = #tpu.pipeline_mode<synchronous>, transform_indices = @transform_1, window_bounds = array<i64: 16, 128>}, {pipeline_mode = #tpu.pipeline_mode<synchronous>, transform_indices = @transform_2, window_bounds = array<i64: 1, 128>}, {pipeline_mode = #tpu.pipeline_mode<synchronous>, transform_indices = @transform_3, window_bounds = array<i64: 128, 128>}, {pipeline_mode = #tpu.pipeline_mode<synchronous>, transform_indices = @transform_4, window_bounds = array<i64: 1, 128>}, {pipeline_mode = #tpu.pipeline_mode<synchronous>, transform_indices = @transform_5, window_bounds = array<i64: 128, 128>}, {pipeline_mode = #tpu.pipeline_mode<synchronous>, transform_indices = @transform_6, window_bounds = array<i64: 1, 128>}, {pipeline_mode = #tpu.pipeline_mode<synchronous>, transform_indices = @transform_7, window_bounds = array<i64: 128, 128>}, {pipeline_mode = #tpu.pipeline_mode<synchronous>, transform_indices = @transform_8, window_bounds = array<i64: 1, 128>}, {pipeline_mode = #tpu.pipeline_mode<synchronous>, transform_indices = @transform_9, window_bounds = array<i64: 128, 128>}, {pipeline_mode = #tpu.pipeline_mode<synchronous>, transform_indices = @transform_10, window_bounds = array<i64: 1, 128>}, {pipeline_mode = #tpu.pipeline_mode<synchronous>, transform_indices = @transform_11, window_bounds = array<i64: 128, 128>}, {pipeline_mode = #tpu.pipeline_mode<synchronous>, transform_indices = @transform_12, window_bounds = array<i64: 1, 128>}, {pipeline_mode = #tpu.pipeline_mode<synchronous>, transform_indices = @transform_13, window_bounds = array<i64: 1, 128>}, {pipeline_mode = #tpu.pipeline_mode<synchronous>, transform_indices = @transform_14, window_bounds = array<i64: 1, 128>}, {transform_indices = @transform_15, window_bounds = array<i64: 16, 128>}, {transform_indices = @transform_16, window_bounds = array<i64: 16, 128>}]} {
    %c0 = arith.constant 0 : index
    %c0_0 = arith.constant 0 : index
    %0 = vector.load %arg1[%c0, %c0_0] : memref<16x16xf32, #tpu.memory_space<vmem>>, vector<16x16xf32>
    %c0_1 = arith.constant 0 : index
    %c0_2 = arith.constant 0 : index
    %1 = vector.load %arg2[%c0_1, %c0_2] : memref<16x128xbf16, #tpu.memory_space<vmem>>, vector<16x128xbf16>
    %2 = arith.truncf %0 : vector<16x16xf32> to vector<16x16xbf16>
    %cst = arith.constant dense<0.000000e+00> : vector<16x128xf32>
    %3 = tpu.matmul %2, %1, %cst {dimension_numbers = #tpu.dot_dimension_numbers<[1], [0], [0], [1], [0, 0, 1, 1], [], []>} : vector<16x16xbf16>, vector<16x128xbf16>, vector<16x128xf32> -> vector<16x128xf32>
    %c0_3 = arith.constant 0 : index
    %c0_4 = arith.constant 0 : index
    %4 = vector.load %arg3[%c0_3, %c0_4] : memref<1x128xf32, #tpu.memory_space<vmem>>, vector<1x128xf32>
    %5 = vector.broadcast %4 : vector<1x128xf32> to vector<16x128xf32>
    %6 = arith.addf %3, %5 : vector<16x128xf32>
    %cst_5 = arith.constant 0.000000e+00 : f32
    %7 = vector.broadcast %cst_5 : f32 to vector<16x128xf32>
    %8 = arith.maximumf %6, %7 : vector<16x128xf32>
    %c0_6 = arith.constant 0 : index
    %c0_7 = arith.constant 0 : index
    %9 = vector.load %arg4[%c0_6, %c0_7] : memref<128x128xbf16, #tpu.memory_space<vmem>>, vector<128x128xbf16>
    %10 = arith.truncf %8 : vector<16x128xf32> to vector<16x128xbf16>
    %cst_8 = arith.constant dense<0.000000e+00> : vector<16x128xf32>
    %11 = tpu.matmul %10, %9, %cst_8 {dimension_numbers = #tpu.dot_dimension_numbers<[1], [0], [0], [1], [0, 0, 1, 1], [], []>} : vector<16x128xbf16>, vector<128x128xbf16>, vector<16x128xf32> -> vector<16x128xf32>
    %c0_9 = arith.constant 0 : index
    %c0_10 = arith.constant 0 : index
    %12 = vector.load %arg5[%c0_9, %c0_10] : memref<1x128xf32, #tpu.memory_space<vmem>>, vector<1x128xf32>
    %13 = vector.broadcast %12 : vector<1x128xf32> to vector<16x128xf32>
    %14 = arith.addf %11, %13 : vector<16x128xf32>
    %cst_11 = arith.constant 0.000000e+00 : f32
    %15 = vector.broadcast %cst_11 : f32 to vector<16x128xf32>
    %16 = arith.maximumf %14, %15 : vector<16x128xf32>
    %c0_12 = arith.constant 0 : index
    %c0_13 = arith.constant 0 : index
    %17 = vector.load %arg6[%c0_12, %c0_13] : memref<128x128xbf16, #tpu.memory_space<vmem>>, vector<128x128xbf16>
    %18 = arith.truncf %16 : vector<16x128xf32> to vector<16x128xbf16>
    %cst_14 = arith.constant dense<0.000000e+00> : vector<16x128xf32>
    %19 = tpu.matmul %18, %17, %cst_14 {dimension_numbers = #tpu.dot_dimension_numbers<[1], [0], [0], [1], [0, 0, 1, 1], [], []>} : vector<16x128xbf16>, vector<128x128xbf16>, vector<16x128xf32> -> vector<16x128xf32>
    %c0_15 = arith.constant 0 : index
    %c0_16 = arith.constant 0 : index
    %20 = vector.load %arg7[%c0_15, %c0_16] : memref<1x128xf32, #tpu.memory_space<vmem>>, vector<1x128xf32>
    %21 = vector.broadcast %20 : vector<1x128xf32> to vector<16x128xf32>
    %22 = arith.addf %19, %21 : vector<16x128xf32>
    %cst_17 = arith.constant 0.000000e+00 : f32
    %23 = vector.broadcast %cst_17 : f32 to vector<16x128xf32>
    %24 = arith.maximumf %22, %23 : vector<16x128xf32>
    %cst_18 = arith.constant dense<0.000000e+00> : vector<16xf32>
    %25 = vector.multi_reduction <add>, %24, %cst_18 [1] : vector<16x128xf32> to vector<16xf32>
    %26 = vector.shape_cast %25 : vector<16xf32> to vector<16x1xf32>
    %27 = arith.mulf %24, %24 : vector<16x128xf32>
    %cst_19 = arith.constant dense<0.000000e+00> : vector<16xf32>
    %28 = vector.multi_reduction <add>, %27, %cst_19 [1] : vector<16x128xf32> to vector<16xf32>
    %29 = vector.shape_cast %28 : vector<16xf32> to vector<16x1xf32>
    %cst_20 = arith.constant 6.250000e-02 : f32
    %30 = vector.broadcast %cst_20 : f32 to vector<16x1xf32>
    %31 = arith.mulf %26, %30 : vector<16x1xf32>
    %cst_21 = arith.constant 6.250000e-02 : f32
    %32 = vector.broadcast %cst_21 : f32 to vector<16x1xf32>
    %33 = arith.mulf %29, %32 : vector<16x1xf32>
    %34 = arith.mulf %31, %31 : vector<16x1xf32>
    %35 = arith.subf %33, %34 : vector<16x1xf32>
    %cst_22 = arith.constant 0.000000e+00 : f32
    %36 = vector.broadcast %cst_22 : f32 to vector<16x1xf32>
    %37 = arith.maximumf %35, %36 : vector<16x1xf32>
    %38 = vector.broadcast %31 : vector<16x1xf32> to vector<16x128xf32>
    %39 = arith.subf %24, %38 : vector<16x128xf32>
    %cst_23 = arith.constant 9.99999974E-6 : f32
    %40 = vector.broadcast %cst_23 : f32 to vector<16x1xf32>
    %41 = arith.addf %37, %40 : vector<16x1xf32>
    %42 = math.rsqrt %41 : vector<16x1xf32>
    %43 = vector.broadcast %42 : vector<16x1xf32> to vector<16x128xf32>
    %44 = arith.mulf %39, %43 : vector<16x128xf32>
    %c0_24 = arith.constant 0 : index
    %c0_25 = arith.constant 0 : index
    %45 = vector.load %arg14[%c0_24, %c0_25] : memref<1x128xf32, #tpu.memory_space<vmem>>, vector<1x128xf32>
    %46 = vector.broadcast %45 : vector<1x128xf32> to vector<16x128xf32>
    %47 = arith.mulf %44, %46 : vector<16x128xf32>
    %c0_26 = arith.constant 0 : index
    %c0_27 = arith.constant 0 : index
    %48 = vector.load %arg15[%c0_26, %c0_27] : memref<1x128xf32, #tpu.memory_space<vmem>>, vector<1x128xf32>
    %49 = vector.broadcast %48 : vector<1x128xf32> to vector<16x128xf32>
    %50 = arith.addf %47, %49 : vector<16x128xf32>
    %c0_28 = arith.constant 0 : index
    %c0_29 = arith.constant 0 : index
    %51 = vector.load %arg17[%c0_28, %c0_29] : memref<16x128xf32, #tpu.memory_space<vmem>>, vector<16x128xf32>
    tpu.vector_store %arg17[%c0_28, %c0_29], %50 {strides = array<i32>} : memref<16x128xf32, #tpu.memory_space<vmem>>, vector<16x128xf32>,
    %c0_30 = arith.constant 0 : index
    %c0_31 = arith.constant 0 : index
    %52 = vector.load %arg8[%c0_30, %c0_31] : memref<128x128xbf16, #tpu.memory_space<vmem>>, vector<128x128xbf16>
    %53 = arith.truncf %50 : vector<16x128xf32> to vector<16x128xbf16>
    %cst_32 = arith.constant dense<0.000000e+00> : vector<16x128xf32>
    %54 = tpu.matmul %53, %52, %cst_32 {dimension_numbers = #tpu.dot_dimension_numbers<[1], [0], [0], [1], [0, 0, 1, 1], [], []>} : vector<16x128xbf16>, vector<128x128xbf16>, vector<16x128xf32> -> vector<16x128xf32>
    %c0_33 = arith.constant 0 : index
    %c0_34 = arith.constant 0 : index
    %55 = vector.load %arg9[%c0_33, %c0_34] : memref<1x128xf32, #tpu.memory_space<vmem>>, vector<1x128xf32>
    %56 = vector.broadcast %55 : vector<1x128xf32> to vector<16x128xf32>
    %57 = arith.addf %54, %56 : vector<16x128xf32>
    %cst_35 = arith.constant 0.000000e+00 : f32
    %58 = vector.broadcast %cst_35 : f32 to vector<16x128xf32>
    %59 = arith.maximumf %57, %58 : vector<16x128xf32>
    %c0_36 = arith.constant 0 : index
    %c0_37 = arith.constant 0 : index
    %60 = vector.load %arg10[%c0_36, %c0_37] : memref<128x128xbf16, #tpu.memory_space<vmem>>, vector<128x128xbf16>
    %61 = arith.truncf %59 : vector<16x128xf32> to vector<16x128xbf16>
    %cst_38 = arith.constant dense<0.000000e+00> : vector<16x128xf32>
    %62 = tpu.matmul %61, %60, %cst_38 {dimension_numbers = #tpu.dot_dimension_numbers<[1], [0], [0], [1], [0, 0, 1, 1], [], []>} : vector<16x128xbf16>, vector<128x128xbf16>, vector<16x128xf32> -> vector<16x128xf32>
    %c0_39 = arith.constant 0 : index
    %c0_40 = arith.constant 0 : index
    %63 = vector.load %arg11[%c0_39, %c0_40] : memref<1x128xf32, #tpu.memory_space<vmem>>, vector<1x128xf32>
    %64 = vector.broadcast %63 : vector<1x128xf32> to vector<16x128xf32>
    %65 = arith.addf %62, %64 : vector<16x128xf32>
    %cst_41 = arith.constant 0.000000e+00 : f32
    %66 = vector.broadcast %cst_41 : f32 to vector<16x128xf32>
    %67 = arith.maximumf %65, %66 : vector<16x128xf32>
    %c0_42 = arith.constant 0 : index
    %c0_43 = arith.constant 0 : index
    %68 = vector.load %arg12[%c0_42, %c0_43] : memref<128x128xbf16, #tpu.memory_space<vmem>>, vector<128x128xbf16>
    %69 = arith.truncf %67 : vector<16x128xf32> to vector<16x128xbf16>
    %cst_44 = arith.constant dense<0.000000e+00> : vector<16x128xf32>
    %70 = tpu.matmul %69, %68, %cst_44 {dimension_numbers = #tpu.dot_dimension_numbers<[1], [0], [0], [1], [0, 0, 1, 1], [], []>} : vector<16x128xbf16>, vector<128x128xbf16>, vector<16x128xf32> -> vector<16x128xf32>
    %c0_45 = arith.constant 0 : index
    %c0_46 = arith.constant 0 : index
    %71 = vector.load %arg13[%c0_45, %c0_46] : memref<1x128xf32, #tpu.memory_space<vmem>>, vector<1x128xf32>
    %72 = vector.broadcast %71 : vector<1x128xf32> to vector<16x128xf32>
    %73 = arith.addf %70, %72 : vector<16x128xf32>
    %c0_47 = arith.constant 0 : index
    %c0_48 = arith.constant 0 : index
    %74 = vector.load %arg16[%c0_47, %c0_48] : memref<16x128xf32, #tpu.memory_space<vmem>>, vector<16x128xf32>
    tpu.vector_store %arg16[%c0_47, %c0_48], %73 {strides = array<i32>} : memref<16x128xf32, #tpu.memory_space<vmem>>, vector<16x128xf32>,
    return
  }
  func.func @transform_0(%arg0: i32) -> (i32, i32) {
    %c0_i32 = arith.constant 0 : i32
    %c0_i32_0 = arith.constant 0 : i32
    return %arg0, %c0_i32 : i32, i32
  }
  func.func @transform_1(%arg0: i32) -> (i32, i32) {
    %c0_i32 = arith.constant 0 : i32
    %c0_i32_0 = arith.constant 0 : i32
    %c0_i32_1 = arith.constant 0 : i32
    return %c0_i32, %c0_i32_0 : i32, i32
  }
  func.func @transform_2(%arg0: i32) -> (i32, i32) {
    %c0_i32 = arith.constant 0 : i32
    %c0_i32_0 = arith.constant 0 : i32
    %c0_i32_1 = arith.constant 0 : i32
    return %c0_i32, %c0_i32_0 : i32, i32
  }
  func.func @transform_3(%arg0: i32) -> (i32, i32) {
    %c0_i32 = arith.constant 0 : i32
    %c0_i32_0 = arith.constant 0 : i32
    %c0_i32_1 = arith.constant 0 : i32
    return %c0_i32, %c0_i32_0 : i32, i32
  }
  func.func @transform_4(%arg0: i32) -> (i32, i32) {
    %c0_i32 = arith.constant 0 : i32
    %c0_i32_0 = arith.constant 0 : i32
    %c0_i32_1 = arith.constant 0 : i32
    return %c0_i32, %c0_i32_0 : i32, i32
  }
  func.func @transform_5(%arg0: i32) -> (i32, i32) {
    %c0_i32 = arith.constant 0 : i32
    %c0_i32_0 = arith.constant 0 : i32
    %c0_i32_1 = arith.constant 0 : i32
    return %c0_i32, %c0_i32_0 : i32, i32
  }
  func.func @transform_6(%arg0: i32) -> (i32, i32) {
    %c0_i32 = arith.constant 0 : i32
    %c0_i32_0 = arith.constant 0 : i32
    %c0_i32_1 = arith.constant 0 : i32
    return %c0_i32, %c0_i32_0 : i32, i32
  }
  func.func @transform_7(%arg0: i32) -> (i32, i32) {
    %c0_i32 = arith.constant 0 : i32
    %c0_i32_0 = arith.constant 0 : i32
    %c0_i32_1 = arith.constant 0 : i32
    return %c0_i32, %c0_i32_0 : i32, i32
  }
  func.func @transform_8(%arg0: i32) -> (i32, i32) {
    %c0_i32 = arith.constant 0 : i32
    %c0_i32_0 = arith.constant 0 : i32
    %c0_i32_1 = arith.constant 0 : i32
    return %c0_i32, %c0_i32_0 : i32, i32
  }
  func.func @transform_9(%arg0: i32) -> (i32, i32) {
    %c0_i32 = arith.constant 0 : i32
    %c0_i32_0 = arith.constant 0 : i32
    %c0_i32_1 = arith.constant 0 : i32
    return %c0_i32, %c0_i32_0 : i32, i32
  }
  func.func @transform_10(%arg0: i32) -> (i32, i32) {
    %c0_i32 = arith.constant 0 : i32
    %c0_i32_0 = arith.constant 0 : i32
    %c0_i32_1 = arith.constant 0 : i32
    return %c0_i32, %c0_i32_0 : i32, i32
  }
  func.func @transform_11(%arg0: i32) -> (i32, i32) {
    %c0_i32 = arith.constant 0 : i32
    %c0_i32_0 = arith.constant 0 : i32
    %c0_i32_1 = arith.constant 0 : i32
    return %c0_i32, %c0_i32_0 : i32, i32
  }
  func.func @transform_12(%arg0: i32) -> (i32, i32) {
    %c0_i32 = arith.constant 0 : i32
    %c0_i32_0 = arith.constant 0 : i32
    %c0_i32_1 = arith.constant 0 : i32
    return %c0_i32, %c0_i32_0 : i32, i32
  }
  func.func @transform_13(%arg0: i32) -> (i32, i32) {
    %c0_i32 = arith.constant 0 : i32
    %c0_i32_0 = arith.constant 0 : i32
    %c0_i32_1 = arith.constant 0 : i32
    return %c0_i32, %c0_i32_0 : i32, i32
  }
  func.func @transform_14(%arg0: i32) -> (i32, i32) {
    %c0_i32 = arith.constant 0 : i32
    %c0_i32_0 = arith.constant 0 : i32
    %c0_i32_1 = arith.constant 0 : i32
    return %c0_i32, %c0_i32_0 : i32, i32
  }
  func.func @transform_15(%arg0: i32) -> (i32, i32) {
    %c0_i32 = arith.constant 0 : i32
    %c0_i32_0 = arith.constant 0 : i32
    return %arg0, %c0_i32 : i32, i32
  }
  func.func @transform_16(%arg0: i32) -> (i32, i32) {
    %c0_i32 = arith.constant 0 : i32
    %c0_i32_0 = arith.constant 0 : i32
    return %arg0, %c0_i32 : i32, i32
  }
}

</mosaic_0001>

<bundles_post_ra>
// kernel: tpu_custom_call.1
= control target key start
LH: loop header
LB: loop body
LE: loop exit
PB: predicated region body
PF: predicated region fallthrough
CT: control target
= control target key end

     0   :  { %s1371_s0 = inlined_call_operand.hbm [shape: f32[16,16], index: 0, kind: input, shape index: {}]   ;;  %s1372_s1 = inlined_call_operand.hbm [shape: bf16[16,128], index: 1, kind: input, shape index: {}]   ;;  %s1373_s2 = inlined_call_operand.vmem [shape: f32[1,128], index: 2, kind: input, shape index: {}]   ;;  %s1374_s3 = inlined_call_operand.hbm [shape: bf16[128,128], index: 3, kind: input, shape index: {}]   ;;  %s1375_s4 = inlined_call_operand.vmem [shape: f32[1,128], index: 4, kind: input, shape index: {}]   ;;  %s1376_s5 = inlined_call_operand.hbm [shape: bf16[128,128], index: 5, kind: input, shape index: {}]   ;;  %s1377_s6 = inlined_call_operand.vmem [shape: f32[1,128], index: 6, kind: input, shape index: {}]   ;;  %s1378_s7 = inlined_call_operand.hbm [shape: bf16[128,128], index: 7, kind: input, shape index: {}]   ;;  %s1379_s8 = inlined_call_operand.vmem [shape: f32[1,128], index: 8, kind: input, shape index: {}]   ;;  %s1380_s9 = inlined_call_operand.hbm [shape: bf16[128,128], index: 9, kind: input, shape index: {}]   ;;  %s1381_s10 = inlined_call_operand.vmem [shape: f32[1,128], index: 10, kind: input, shape index: {}]   ;;  %s1382_s11 = inlined_call_operand.hbm [shape: bf16[128,128], index: 11, kind: input, shape index: {}]   ;;  %s1383_s12 = inlined_call_operand.vmem [shape: f32[1,128], index: 12, kind: input, shape index: {}]   ;;  %s1384_s13 = inlined_call_operand.vmem [shape: f32[1,128], index: 13, kind: input, shape index: {}]   ;;  %s1385_s14 = inlined_call_operand.vmem [shape: f32[1,128], index: 14, kind: input, shape index: {}]   ;;  %s1386_s15 = inlined_call_operand.hbm [shape: f32[16,128], index: 15, kind: output, shape index: {0}]   ;;  %s1387_s16 = inlined_call_operand.hbm [shape: f32[16,128], index: 16, kind: output, shape index: {1}]  }
   0x1   :  { %1388 = sst [smem:[#allocation23_spill]] %s1371_s0 }
   0x2   :  { %22 = vsyncpa [#allocation3], 0 }
   0x3   :  { %23 = vsyncpa [#allocation6], 0 }
   0x4   :  { %24 = vsyncpa [#allocation9], 0 }
   0x5   :  { %25 = vsyncpa [#allocation12], 0 }
   0x6   :  { %26 = vsyncpa [#allocation4], 0  ;;  %s45_s23 = sshll.u32 %s1372_s1, 4  ;;  %s46_s23 = int_to_ptr.hbm [resolvable:$true] %s45_s23 }
   0x7   :  { %27 = vsyncpa [#allocation16], 0  ;;  %s1183_s24 = smov [#allocation5]   ;;  %s75_s28 = sshll.u32 %s1376_s5, 4  ;;  %s76_s28 = int_to_ptr.hbm [resolvable:$true] %s75_s28 }
   0x8   :  { %s47_s25 = sshll.u32 %s1183_s24, 4  ;;  %s1184_s29 = smov 64   ;;  %s48_s25 = int_to_ptr.vmem [resolvable:$true] %s47_s25 }
   0x9   :  { %s1185_s30 = smov 4   ;;  %s1186_s0 = smov [#allocation8]  }
   0xa   :  { %53 = dma.hbm_to_vmem [thread:$0]  %s46_s23, 128, %s48_s25, [#allocation6], %s1184_s29, %s1184_s29, %s1185_s30  }
   0xb   :  { %s77_s17 = sshll.u32 %s1186_s0, 4  ;;  %s105_s19 = sshll.u32 %s1380_s9, 4  ;;  %s78_s17 = int_to_ptr.vmem [resolvable:$true] %s77_s17  ;;  %s106_s19 = int_to_ptr.hbm [resolvable:$true] %s105_s19 }
   0xc   :  { %83 = dma.hbm_to_vmem [thread:$0]  %s76_s28, 1024, %s78_s17, [#allocation9], %s1184_s29, %s1184_s29, %s1185_s30  }
   0xd   :  { %s1389_s21 = sld [smem:[#allocation23_spill]]  ;;  %s1187_s24 = smov [#allocation11]  }
   0xe   :  { %s107_s26 = sshll.u32 %s1187_s24, 4  ;;  %s1188_s23 = smov [#allocation2]   ;;  %s108_s26 = int_to_ptr.vmem [resolvable:$true] %s107_s26 }
   0xf   :  { %113 = dma.hbm_to_vmem [thread:$0]  %s106_s19, 1024, %s108_s26, [#allocation12], %s1184_s29, %s1184_s29, %s1185_s30  }
  0x10   :  { %s34_s9 = sshll.u32 %s1188_s23, 4  ;;  %s1189_s25 = smov 128   ;;  %s35_s9 = int_to_ptr.vmem [resolvable:$true] %s34_s9 }
  0x11   :  { %s1190_s27 = smov 8   ;;  %s60_s17 = sshll.u32 %s1374_s3, 4  ;;  %s61_s17 = int_to_ptr.hbm [resolvable:$true] %s60_s17 }
  0x12   :  { %s1191_s18 = smov [#allocation7]   ;;  %s90_s19 = sshll.u32 %s1378_s7, 4  ;;  %s91_s19 = int_to_ptr.hbm [resolvable:$true] %s90_s19 }
  0x13   :  { %s32_s22 = sshll.u32 %s1389_s21, 4  ;;  %s62_s1 = sshll.u32 %s1191_s18, 4  ;;  %s33_s22 = int_to_ptr.hbm [resolvable:$true] %s32_s22  ;;  %s63_s1 = int_to_ptr.vmem [resolvable:$true] %s62_s1 }
  0x14   :  { %40 = dma.hbm_to_vmem [thread:$0]  %s33_s22, 256, %s35_s9, [#allocation3], %s1189_s25, %s1189_s25, %s1190_s27  }
  0x15   :  { %68 = dma.hbm_to_vmem [thread:$0]  %s61_s17, 1024, %s63_s1, [#allocation6], %s1184_s29, %s1184_s29, %s1185_s30  }
  0x16   :  { %s1192_s21 = smov [#allocation10]   ;;  %s120_s23 = sshll.u32 %s1382_s11, 4  ;;  %s121_s23 = int_to_ptr.hbm [resolvable:$true] %s120_s23 }
  0x17   :  { %s92_s24 = sshll.u32 %s1192_s21, 4  ;;  %s1193_s3 = smov [#allocation13]   ;;  %s93_s24 = int_to_ptr.vmem [resolvable:$true] %s92_s24 }
  0x18   :  { %98 = dma.hbm_to_vmem [thread:$0]  %s91_s19, 1024, %s93_s24, [#allocation9], %s1184_s29, %s1184_s29, %s1185_s30  }
  0x19   :  { %s122_s9 = sshll.u32 %s1193_s3, 4  ;;  %s123_s9 = int_to_ptr.vmem [resolvable:$true] %s122_s9 }
  0x1a   :  { %128 = dma.hbm_to_vmem [thread:$0]  %s121_s23, 1024, %s123_s9, [#allocation12], %s1184_s29, %s1184_s29, %s1185_s30  }
  0x1b   :  { %1171 = dma.done.wait [#allocation3], 256  }
  0x1c   :  { %1172 = vsyncadd [#allocation3], 4294967040 }
  0x1d   :  { %1173 = dma.done.wait [#allocation6], 1152  }
  0x1e   :  { %1174 = vsyncadd [#allocation6], 4294966144 }
  0x1f   :  { %1175 = dma.done.wait [#allocation9], 2048  }
  0x20   :  { %1176 = vsyncadd [#allocation9], 4294965248 }
  0x21   :  { %1177 = dma.done.wait [#allocation12], 2048  }
  0x22   :  { %1178 = vsyncadd [#allocation12], 4294965248  ;;  %v889_v0 = vld [vmem:[#allocation5] sm:$0xff]  ;;  %v164_v1 = vld [vmem:[#allocation2] sm:$0xff]  ;;  %vm179_vm0 = vcmask 130048   ;;  %s703_s21 = sshll.u32 %s1387_s16, 4  ;;  %s704_s21 = int_to_ptr.hbm [resolvable:$true] %s703_s21 }
  0x23   :  { %v165_v2 = vld [vmem:[#allocation2 + $0x8] sm:$0xff]  ;;  %v897_v4 = vld [vmem:[#allocation7 + $0x38] sm:$0xff]  ;;  %190 = vmatpush.bf16.msra.mxu0 %v889_v0  ;;  %v895_v6 = vld [vmem:[#allocation7 + $0x28] sm:$0xff]  ;;  %s1195_s22 = smov [#allocation14]   ;;  %s690_s9 = sshll.u32 %s1386_s15, 4  ;;  %s691_s9 = int_to_ptr.hbm [resolvable:$true] %s690_s9 }
  0x24   :  { %v168_v3 = vpack.c.bf16 %v165_v2, %v164_v1  ;;  %v896_v5 = vld [vmem:[#allocation7 + $0x30] sm:$0xff]  ;;  %268 = vmatpush.bf16.msra.mxu1 %v897_v4  ;;  %v894_v7 = vld [vmem:[#allocation7 + $0x20] sm:$0xff]  ;;  %v893_v8 = vld [vmem:[#allocation7 + $0x18] sm:$0xff]  ;;  %s688_s26 = sshll.u32 %s1195_s22, 4  ;;  %s689_s26 = int_to_ptr.vmem [resolvable:$true] %s688_s26 }
  0x25   :  { %v892_v9 = vld [vmem:[#allocation7 + $0x10] sm:$0xff]  ;;  %v891_v10 = vld [vmem:[#allocation7 + $0x8] sm:$0xff]  ;;  %v890_v11 = vld [vmem:[#allocation7] sm:$0xff] }
  0x26   :  { %728 = vmatmul.msk.bf16.vlgmr.msra.gmra.mxu0 %vm179_vm0, %v168_v3  ;;  %v905_v12 = vld [vmem:[#allocation8 + $0x38] sm:$0xff]  ;;  %v904_v13 = vld [vmem:[#allocation8 + $0x30] sm:$0xff]  ;;  %v903_v14 = vld [vmem:[#allocation8 + $0x28] sm:$0xff] }
  0x27   :  { %353 = vmatpush.bf16.msra.mxu2 %v905_v12  ;;  %v902_v15 = vld [vmem:[#allocation8 + $0x20] sm:$0xff]  ;;  %v943_v17 = vld [vmem:[%s1373_s2] ss:$0 sm:$0xff]  ;;  %v901_v24 = vld [vmem:[#allocation8 + $0x18] sm:$0xff] }
  0x28   :  { %269 = vmatpush.bf16.msra.mxu1 %v896_v5  ;;  %v900_v25 = vld [vmem:[#allocation8 + $0x10] sm:$0xff]  ;;  %v899_v26 = vld [vmem:[#allocation8 + $0x8] sm:$0xff]  ;;  %v898_v27 = vld [vmem:[#allocation8] sm:$0xff] }
  0x29   :  { %v944_v29 = vld [vmem:[%s1375_s4] ss:$0 sm:$0xff]  ;;  %v913_v45 = vld [vmem:[#allocation10 + $0x38] sm:$0xff]  ;;  %v912_v46 = vld [vmem:[#allocation10 + $0x30] sm:$0xff] }
  0x2a   :  { %v945_v36 = vld [vmem:[%s1377_s6] ss:$0 sm:$0xff]  ;;  %498 = vmatpush.bf16.msra.mxu3 %v913_v45  ;;  %v910_v48 = vld [vmem:[#allocation10 + $0x20] sm:$0xff]  ;;  %v909_v49 = vld [vmem:[#allocation10 + $0x18] sm:$0xff] }
  0x2b   :  { %354 = vmatpush.bf16.msra.mxu2 %v904_v13  ;;  %v911_v47 = vld [vmem:[#allocation10 + $0x28] sm:$0xff]  ;;  %v908_v52 = vld [vmem:[#allocation10 + $0x10] sm:$0xff]  ;;  %v906_v59 = vld [vmem:[#allocation10] sm:$0xff] }
  0x2c   :  { %270 = vmatpush.bf16.msra.mxu1 %v895_v6  ;;  %v907_v56 = vld [vmem:[#allocation10 + $0x8] sm:$0xff]  ;;  %v921_v3 = vld [vmem:[#allocation11 + $0x38] sm:$0xff]  ;;  %v920_v5 = vld [vmem:[#allocation11 + $0x30] sm:$0xff] }
  0x2d   :  { %583 = vmatpush.bf16.msrb.mxu0 %v921_v3  ;;  %v918_v13 = vld [vmem:[#allocation11 + $0x20] sm:$0xff] }
  0x2e   :  { %499 = vmatpush.bf16.msra.mxu3 %v912_v46 }
  0x2f   :  { %355 = vmatpush.bf16.msra.mxu2 %v903_v14 }
  0x30   :  { %271 = vmatpush.bf16.msra.mxu1 %v894_v7 }
  0x31   :  { %584 = vmatpush.bf16.msrb.mxu0 %v920_v5 }
  0x32   :  { %500 = vmatpush.bf16.msra.mxu3 %v911_v47 }
  0x33   :  { %356 = vmatpush.bf16.msra.mxu2 %v902_v15 }
  0x34   :  { %272 = vmatpush.bf16.msra.mxu1 %v893_v8 }
  0x36   :  { %501 = vmatpush.bf16.msra.mxu3 %v910_v48 }
  0x37   :  { %357 = vmatpush.bf16.msra.mxu2 %v901_v24 }
  0x38   :  { %273 = vmatpush.bf16.msra.mxu1 %v892_v9 }
  0x3a   :  { %502 = vmatpush.bf16.msra.mxu3 %v909_v49 }
  0x3b   :  { %358 = vmatpush.bf16.msra.mxu2 %v900_v25 }
  0x3c   :  { %274 = vmatpush.bf16.msra.mxu1 %v891_v10  ;;  %v919_v10 = vld [vmem:[#allocation11 + $0x28] sm:$0xff] }
  0x3d   :  { %585 = vmatpush.bf16.msrb.mxu0 %v919_v10 }
  0x3e   :  { %503 = vmatpush.bf16.msra.mxu3 %v908_v52  ;;  %v923_v52 = vld [vmem:[#allocation13 + $0x8] sm:$0xff] }
  0x3f   :  { %359 = vmatpush.bf16.msra.mxu2 %v899_v26 }
  0x40   :  { %275 = vmatpush.bf16.msra.mxu1 %v890_v11 }
  0x41   :  { %586 = vmatpush.bf16.msrb.mxu0 %v918_v13 }
  0x42   :  { %504 = vmatpush.bf16.msra.mxu3 %v907_v56 }
  0x43   :  { %360 = vmatpush.bf16.msra.mxu2 %v898_v27 }
  0x46   :  { %505 = vmatpush.bf16.msra.mxu3 %v906_v59 }
  0xa3   :  { %v192_v16 = vpop.f32.mrf.mxu0 }
  0xa4   :  { %v193_v18 = vadd.f32 %v943_v17, %v192_v16 }
  0xa6   :  { %v197_v21 = vmax.f32 %v193_v18, 0.0  ;;  %v946_v18 = vld [vmem:[%s1384_s13] ss:$0 sm:$0xff] }
  0xab   :  { %v194_v19 = vpop.f32.mrf.mxu0 }
  0xac   :  { %v195_v20 = vadd.f32 %v943_v17, %v194_v19 }
  0xae   :  { %v198_v22 = vmax.f32 %v195_v20, 0.0 }
  0xb0   :  { %v215_v23 = vpack.c.bf16 %v198_v22, %v197_v21  ;;  %v947_v22 = vld [vmem:[%s1385_s14] ss:$0 sm:$0xff] }
  0xb2   :  { %276 = vmatmul.bf16.vlgmr.msra.gmra.mxu1 %v215_v23 }
 0x12f   :  { %v277_v28 = vpop.f32.mrf.mxu1 }
 0x130   :  { %v278_v30 = vadd.f32 %v944_v29, %v277_v28 }
 0x132   :  { %v282_v33 = vmax.f32 %v278_v30, 0.0 }
 0x137   :  { %v279_v31 = vpop.f32.mrf.mxu1 }
 0x138   :  { %v280_v32 = vadd.f32 %v944_v29, %v279_v31 }
 0x13a   :  { %v283_v34 = vmax.f32 %v280_v32, 0.0 }
 0x13c   :  { %v300_v35 = vpack.c.bf16 %v283_v34, %v282_v33  ;;  %v917_v34 = vld [vmem:[#allocation11 + $0x18] sm:$0xff] }
 0x13d   :  { %587 = vmatpush.bf16.msrb.mxu0 %v917_v34 }
 0x13e   :  { %361 = vmatmul.bf16.vlgmr.msra.gmra.mxu2 %v300_v35  ;;  %v916_v35 = vld [vmem:[#allocation11 + $0x10] sm:$0xff] }
 0x141   :  { %588 = vmatpush.bf16.msrb.mxu0 %v916_v35 }
 0x1c1   :  { %v362_v37 = vpop.f32.mrf.mxu2 }
 0x1c2   :  { %v363_v38 = vadd.f32 %v945_v36, %v362_v37  ;;  %v914_v37 = vld [vmem:[#allocation11] sm:$0xff] }
 0x1c4   :  { %v1332_v39 = vmax.f32 %v363_v38, 0.0  ;;  %v929_v38 = vld [vmem:[#allocation13 + $0x38] sm:$0xff] }
 0x1c5   :  { %668 = vmatpush.bf16.msrb.mxu1 %v929_v38 }
 0x1c6   :  { %369 = vadd.xlane.f32.xlu0 %v1332_v39  ;;  %v373_v40 = vmul.f32 %v1332_v39, %v1332_v39 }
 0x1c8   :  { %375 = vadd.xlane.f32.xlu1 %v373_v40  ;;  %v927_v40 = vld [vmem:[#allocation13 + $0x28] sm:$0xff] }
 0x1c9   :  { %v364_v41 = vpop.f32.mrf.mxu2 }
 0x1ca   :  { %v365_v42 = vadd.f32 %v945_v36, %v364_v41  ;;  %v915_v36 = vld [vmem:[#allocation11 + $0x8] sm:$0xff]  ;;  %v926_v41 = vld [vmem:[#allocation13 + $0x20] sm:$0xff] }
 0x1cb   :  { %589 = vmatpush.bf16.msrb.mxu0 %v915_v36 }
 0x1cc   :  { %v1337_v43 = vmax.f32 %v365_v42, 0.0 }
 0x1ce   :  { %371 = vadd.xlane.f32.xlu0 %v1337_v43  ;;  %v374_v44 = vmul.f32 %v1337_v43, %v1337_v43 }
 0x1cf   :  { %590 = vmatpush.bf16.msrb.mxu0 %v914_v37 }
 0x1d0   :  { %377 = vadd.xlane.f32.xlu1 %v374_v44 }
 0x239   :  { %v370_v50 = vpop.xlane.xlu0 %369 }
 0x23a   :  { %v379_v51 = vmul.f32 0.0625, %v370_v50  ;;  %v925_v50 = vld [vmem:[#allocation13 + $0x18] sm:$0xff] }
 0x23b   :  { %v376_v53 = vpop.xlane.xlu1 %375 }
 0x23c   :  { %v383_v54 = vmul.f32 %v379_v51, %v379_v51  ;;  %v381_v55 = vmul.f32 0.0625, %v376_v53  ;;  %v389_v16 = vsub.f32 %v1332_v39, %v379_v51  ;;  %v928_v39 = vld [vmem:[#allocation13 + $0x30] sm:$0xff]  ;;  %v922_v53 = vld [vmem:[#allocation13] sm:$0xff] }
 0x23d   :  { %669 = vmatpush.bf16.msrb.mxu1 %v928_v39  ;;  %v924_v51 = vld [vmem:[#allocation13 + $0x10] sm:$0xff] }
 0x23e   :  { %v385_v57 = vsub.f32 %v381_v55, %v383_v54  ;;  %v949_v55 = vld [vmem:[%s1381_s10] ss:$0 sm:$0xff] }
 0x240   :  { %v387_v58 = vmax.f32 %v385_v57, 0.0 }
 0x241   :  { %v372_v60 = vpop.xlane.xlu0 %371  ;;  %670 = vmatpush.bf16.msrb.mxu1 %v927_v40 }
 0x242   :  { %v391_v61 = vadd.f32 1e-05, %v387_v58  ;;  %v380_v62 = vmul.f32 0.0625, %v372_v60 }
 0x243   :  { %v378_v63 = vpop.xlane.xlu1 %377 }
 0x244   :  { %951 = vrsqrt.f32 %v391_v61  ;;  %v384_v0 = vmul.f32 %v380_v62, %v380_v62  ;;  %v382_v1 = vmul.f32 0.0625, %v378_v63  ;;  %vm399_vm2 = vweird.f32 %v391_v61 }
 0x245   :  { %v390_v28 = vsub.f32 %v1337_v43, %v380_v62  ;;  %671 = vmatpush.bf16.msrb.mxu1 %v926_v41  ;;  %v948_v43 = vld [vmem:[%s1379_s8] ss:$0 sm:$0xff]  ;;  %s1194_s8 = smov [#allocation15]  }
 0x246   :  { %v386_v2 = vsub.f32 %v382_v1, %v384_v0  ;;  %s701_s5 = sshll.u32 %s1194_s8, 4  ;;  %v950_v62 = vld [vmem:[%s1383_s12] ss:$0 sm:$0xff]  ;;  %s702_s5 = int_to_ptr.vmem [resolvable:$true] %s701_s5 }
 0x248   :  { %v388_v4 = vmax.f32 %v386_v2, 0.0 }
 0x249   :  { %672 = vmatpush.bf16.msrb.mxu1 %v925_v50 }
 0x24a   :  { %v952_v6 = vpop.eup %951  ;;  %v392_v8 = vadd.f32 1e-05, %v388_v4 }
 0x24b   :  { %v394_v7 = vmul.f32 %v952_v6, %v391_v61  ;;  %vm400_vm1 = vweird.f32 %v952_v6 }
 0x24c   :  { %953 = vrsqrt.f32 %v392_v8  ;;  %vm401_vm3 = vmor %vm399_vm2, %vm400_vm1  ;;  %vm409_vm5 = vweird.f32 %v392_v8 }
 0x24d   :  { %v395_v9 = vmul.f32 %v952_v6, %v394_v7  ;;  %673 = vmatpush.bf16.msrb.mxu1 %v924_v51 }
 0x24f   :  { %v396_v11 = vmul.f32 0.5, %v395_v9 }
 0x251   :  { %v397_v12 = vsub.f32 1.5, %v396_v11  ;;  %674 = vmatpush.bf16.msrb.mxu1 %v923_v52 }
 0x252   :  { %v954_v14 = vpop.eup %953 }
 0x253   :  { %v398_v15 = vmul.f32 %v952_v6, %v397_v12  ;;  %v404_v17 = vmul.f32 %v954_v14, %v392_v8  ;;  %vm410_vm4 = vweird.f32 %v954_v14 }
 0x254   :  { %vm411_vm6 = vmor %vm409_vm5, %vm410_vm4 }
 0x255   :  { %v402_v19 = vsel %vm401_vm3, %v952_v6, %v398_v15  ;;  %v405_v20 = vmul.f32 %v954_v14, %v404_v17  ;;  %675 = vmatpush.bf16.msrb.mxu1 %v922_v53 }
 0x256   :  { %v413_v21 = vmul.f32 %v402_v19, %v389_v16 }
 0x257   :  { %v406_v23 = vmul.f32 0.5, %v405_v20 }
 0x258   :  { %v419_v24 = vmul.f32 %v946_v18, %v413_v21 }
 0x259   :  { %v407_v25 = vsub.f32 1.5, %v406_v23 }
 0x25a   :  { %v425_v26 = vadd.f32 %v947_v22, %v419_v24 }
 0x25b   :  { %v408_v27 = vmul.f32 %v954_v14, %v407_v25 }
 0x25c   :  { %427 = vst [vmem:[#allocation15] sm:$0xff] %v425_v26 }
 0x25d   :  { %v412_v29 = vsel %vm411_vm6, %v954_v14, %v408_v27 }
 0x25e   :  { %v414_v30 = vmul.f32 %v412_v29, %v390_v28 }
 0x260   :  { %v420_v31 = vmul.f32 %v946_v18, %v414_v30 }
 0x262   :  { %v426_v32 = vadd.f32 %v947_v22, %v420_v31 }
 0x264   :  { %428 = vst [vmem:[#allocation15 + $0x8] sm:$0xff] %v426_v32  ;;  %v445_v33 = vpack.c.bf16 %v426_v32, %v425_v26 }
 0x265   :  { %709 = dma.vmem_to_hbm [thread:$0]  %s702_s5, 256, %s704_s21, [#allocation16], %s1189_s25, %s1189_s25, %s1190_s27  }
 0x266   :  { %506 = vmatmul.bf16.vlgmr.msra.gmra.mxu3 %v445_v33 }
 0x2e9   :  { %v507_v42 = vpop.f32.mrf.mxu3 }
 0x2ea   :  { %v508_v44 = vadd.f32 %v948_v43, %v507_v42 }
 0x2ec   :  { %v512_v47 = vmax.f32 %v508_v44, 0.0 }
 0x2f1   :  { %v509_v45 = vpop.f32.mrf.mxu3 }
 0x2f2   :  { %v510_v46 = vadd.f32 %v948_v43, %v509_v45 }
 0x2f4   :  { %v513_v48 = vmax.f32 %v510_v46, 0.0 }
 0x2f6   :  { %v530_v49 = vpack.c.bf16 %v513_v48, %v512_v47 }
 0x2f8   :  { %591 = vmatmul.bf16.vlgmr.msrb.gmra.mxu0 %v530_v49 }
 0x375   :  { %v592_v54 = vpop.f32.mrf.mxu0 }
 0x376   :  { %v593_v56 = vadd.f32 %v949_v55, %v592_v54 }
 0x378   :  { %v597_v59 = vmax.f32 %v593_v56, 0.0 }
 0x37d   :  { %v594_v57 = vpop.f32.mrf.mxu0 }
 0x37e   :  { %v595_v58 = vadd.f32 %v949_v55, %v594_v57 }
 0x380   :  { %v598_v60 = vmax.f32 %v595_v58, 0.0 }
 0x382   :  { %v615_v61 = vpack.c.bf16 %v598_v60, %v597_v59 }
 0x384   :  { %676 = vmatmul.bf16.vlgmr.msrb.gmra.mxu1 %v615_v61 }
 0x401   :  { %v677_v63 = vpop.f32.mrf.mxu1 }
 0x402   :  { %v678_v0 = vadd.f32 %v950_v62, %v677_v63 }
 0x404   :  { %682 = vst [vmem:[#allocation14] sm:$0xff] %v678_v0 }
 0x409   :  { %v679_v1 = vpop.f32.mrf.mxu1 }
 0x40a   :  { %v680_v2 = vadd.f32 %v950_v62, %v679_v1 }
 0x40c   :  { %683 = vst [vmem:[#allocation14 + $0x8] sm:$0xff] %v680_v2 }
 0x40d   :  { %696 = dma.vmem_to_hbm [thread:$0]  %s689_s26, 256, %s691_s9, [#allocation4], %s1189_s25, %s1189_s25, %s1190_s27  }
 0x40e   :  { %1179 = dma.done.wait [#allocation4], 256  }
 0x40f   :  { %1180 = vsyncadd [#allocation4], 4294967040 }
 0x410   :  { %1181 = dma.done.wait [#allocation16], 256  }
 0x411   :  { %1182 = vsyncadd [#allocation16], 4294967040 }
 0x412   :  { %718 = vsyncpa [#allocation3], 1 }
 0x413   :  { %719 = vsyncpa [#allocation6], 1 }
 0x414   :  { %720 = vsyncpa [#allocation9], 1 }
 0x415   :  { %721 = vsyncpa [#allocation12], 1 }
 0x416   :  { %722 = vsyncpa [#allocation4], 1 }
 0x417   :  { %723 = vsyncpa [#allocation16], 1 }

// kernel: tpu_custom_call.1
= control target key start
LH: loop header
LB: loop body
LE: loop exit
PB: predicated region body
PF: predicated region fallthrough
CT: control target
= control target key end

     0   :  { %s1371_s0 = inlined_call_operand.hbm [shape: f32[16,16], index: 0, kind: input, shape index: {}]   ;;  %s1372_s1 = inlined_call_operand.hbm [shape: bf16[16,128], index: 1, kind: input, shape index: {}]   ;;  %s1373_s2 = inlined_call_operand.vmem [shape: f32[1,128], index: 2, kind: input, shape index: {}]   ;;  %s1374_s3 = inlined_call_operand.hbm [shape: bf16[128,128], index: 3, kind: input, shape index: {}]   ;;  %s1375_s4 = inlined_call_operand.vmem [shape: f32[1,128], index: 4, kind: input, shape index: {}]   ;;  %s1376_s5 = inlined_call_operand.hbm [shape: bf16[128,128], index: 5, kind: input, shape index: {}]   ;;  %s1377_s6 = inlined_call_operand.vmem [shape: f32[1,128], index: 6, kind: input, shape index: {}]   ;;  %s1378_s7 = inlined_call_operand.hbm [shape: bf16[128,128], index: 7, kind: input, shape index: {}]   ;;  %s1379_s8 = inlined_call_operand.vmem [shape: f32[1,128], index: 8, kind: input, shape index: {}]   ;;  %s1380_s9 = inlined_call_operand.hbm [shape: bf16[128,128], index: 9, kind: input, shape index: {}]   ;;  %s1381_s10 = inlined_call_operand.vmem [shape: f32[1,128], index: 10, kind: input, shape index: {}]   ;;  %s1382_s11 = inlined_call_operand.hbm [shape: bf16[128,128], index: 11, kind: input, shape index: {}]   ;;  %s1383_s12 = inlined_call_operand.vmem [shape: f32[1,128], index: 12, kind: input, shape index: {}]   ;;  %s1384_s13 = inlined_call_operand.vmem [shape: f32[1,128], index: 13, kind: input, shape index: {}]   ;;  %s1385_s14 = inlined_call_operand.vmem [shape: f32[1,128], index: 14, kind: input, shape index: {}]   ;;  %s1386_s15 = inlined_call_operand.hbm [shape: f32[16,128], index: 15, kind: output, shape index: {0}]   ;;  %s1387_s16 = inlined_call_operand.hbm [shape: f32[16,128], index: 16, kind: output, shape index: {1}]  }
   0x1   :  { %1388 = sst [smem:[#allocation23_spill]] %s1371_s0 }
   0x2   :  { %22 = vsyncpa [#allocation3], 0 }
   0x3   :  { %23 = vsyncpa [#allocation6], 0 }
   0x4   :  { %24 = vsyncpa [#allocation9], 0 }
   0x5   :  { %25 = vsyncpa [#allocation12], 0 }
   0x6   :  { %26 = vsyncpa [#allocation4], 0  ;;  %s45_s23 = sshll.u32 %s1372_s1, 4  ;;  %s46_s23 = int_to_ptr.hbm [resolvable:$true] %s45_s23 }
   0x7   :  { %27 = vsyncpa [#allocation16], 0  ;;  %s1183_s24 = smov [#allocation5]   ;;  %s75_s28 = sshll.u32 %s1376_s5, 4  ;;  %s76_s28 = int_to_ptr.hbm [resolvable:$true] %s75_s28 }
   0x8   :  { %s47_s25 = sshll.u32 %s1183_s24, 4  ;;  %s1184_s29 = smov 64   ;;  %s48_s25 = int_to_ptr.vmem [resolvable:$true] %s47_s25 }
   0x9   :  { %s1185_s30 = smov 4   ;;  %s1186_s0 = smov [#allocation8]  }
   0xa   :  { %53 = dma.hbm_to_vmem [thread:$0]  %s46_s23, 128, %s48_s25, [#allocation6], %s1184_s29, %s1184_s29, %s1185_s30  }
   0xb   :  { %s77_s17 = sshll.u32 %s1186_s0, 4  ;;  %s105_s19 = sshll.u32 %s1380_s9, 4  ;;  %s78_s17 = int_to_ptr.vmem [resolvable:$true] %s77_s17  ;;  %s106_s19 = int_to_ptr.hbm [resolvable:$true] %s105_s19 }
   0xc   :  { %83 = dma.hbm_to_vmem [thread:$0]  %s76_s28, 1024, %s78_s17, [#allocation9], %s1184_s29, %s1184_s29, %s1185_s30  }
   0xd   :  { %s1389_s21 = sld [smem:[#allocation23_spill]]  ;;  %s1187_s24 = smov [#allocation11]  }
   0xe   :  { %s107_s26 = sshll.u32 %s1187_s24, 4  ;;  %s1188_s23 = smov [#allocation2]   ;;  %s108_s26 = int_to_ptr.vmem [resolvable:$true] %s107_s26 }
   0xf   :  { %113 = dma.hbm_to_vmem [thread:$0]  %s106_s19, 1024, %s108_s26, [#allocation12], %s1184_s29, %s1184_s29, %s1185_s30  }
  0x10   :  { %s34_s9 = sshll.u32 %s1188_s23, 4  ;;  %s1189_s25 = smov 128   ;;  %s35_s9 = int_to_ptr.vmem [resolvable:$true] %s34_s9 }
  0x11   :  { %s1190_s27 = smov 8   ;;  %s60_s17 = sshll.u32 %s1374_s3, 4  ;;  %s61_s17 = int_to_ptr.hbm [resolvable:$true] %s60_s17 }
  0x12   :  { %s1191_s18 = smov [#allocation7]   ;;  %s90_s19 = sshll.u32 %s1378_s7, 4  ;;  %s91_s19 = int_to_ptr.hbm [resolvable:$true] %s90_s19 }
  0x13   :  { %s32_s22 = sshll.u32 %s1389_s21, 4  ;;  %s62_s1 = sshll.u32 %s1191_s18, 4  ;;  %s33_s22 = int_to_ptr.hbm [resolvable:$true] %s32_s22  ;;  %s63_s1 = int_to_ptr.vmem [resolvable:$true] %s62_s1 }
  0x14   :  { %40 = dma.hbm_to_vmem [thread:$0]  %s33_s22, 256, %s35_s9, [#allocation3], %s1189_s25, %s1189_s25, %s1190_s27  }
  0x15   :  { %68 = dma.hbm_to_vmem [thread:$0]  %s61_s17, 1024, %s63_s1, [#allocation6], %s1184_s29, %s1184_s29, %s1185_s30  }
  0x16   :  { %s1192_s21 = smov [#allocation10]   ;;  %s120_s23 = sshll.u32 %s1382_s11, 4  ;;  %s121_s23 = int_to_ptr.hbm [resolvable:$true] %s120_s23 }
  0x17   :  { %s92_s24 = sshll.u32 %s1192_s21, 4  ;;  %s1193_s3 = smov [#allocation13]   ;;  %s93_s24 = int_to_ptr.vmem [resolvable:$true] %s92_s24 }
  0x18   :  { %98 = dma.hbm_to_vmem [thread:$0]  %s91_s19, 1024, %s93_s24, [#allocation9], %s1184_s29, %s1184_s29, %s1185_s30  }
  0x19   :  { %s122_s9 = sshll.u32 %s1193_s3, 4  ;;  %s123_s9 = int_to_ptr.vmem [resolvable:$true] %s122_s9 }
  0x1a   :  { %128 = dma.hbm_to_vmem [thread:$0]  %s121_s23, 1024, %s123_s9, [#allocation12], %s1184_s29, %s1184_s29, %s1185_s30  }
  0x1b   :  { %1171 = dma.done.wait [#allocation3], 256  }
  0x1c   :  { %1172 = vsyncadd [#allocation3], 4294967040 }
  0x1d   :  { %1173 = dma.done.wait [#allocation6], 1152  }
  0x1e   :  { %1174 = vsyncadd [#allocation6], 4294966144 }
  0x1f   :  { %1175 = dma.done.wait [#allocation9], 2048  }
  0x20   :  { %1176 = vsyncadd [#allocation9], 4294965248 }
  0x21   :  { %1177 = dma.done.wait [#allocation12], 2048  }
  0x22   :  { %1178 = vsyncadd [#allocation12], 4294965248  ;;  %v889_v0 = vld [vmem:[#allocation5] sm:$0xff]  ;;  %v164_v1 = vld [vmem:[#allocation2] sm:$0xff]  ;;  %vm179_vm0 = vcmask 130048   ;;  %s703_s21 = sshll.u32 %s1387_s16, 4  ;;  %s704_s21 = int_to_ptr.hbm [resolvable:$true] %s703_s21 }
  0x23   :  { %v165_v2 = vld [vmem:[#allocation2 + $0x8] sm:$0xff]  ;;  %v897_v4 = vld [vmem:[#allocation7 + $0x38] sm:$0xff]  ;;  %190 = vmatpush.bf16.msra.mxu0 %v889_v0  ;;  %v895_v6 = vld [vmem:[#allocation7 + $0x28] sm:$0xff]  ;;  %s1195_s22 = smov [#allocation14]   ;;  %s690_s9 = sshll.u32 %s1386_s15, 4  ;;  %s691_s9 = int_to_ptr.hbm [resolvable:$true] %s690_s9 }
  0x24   :  { %v168_v3 = vpack.c.bf16 %v165_v2, %v164_v1  ;;  %v896_v5 = vld [vmem:[#allocation7 + $0x30] sm:$0xff]  ;;  %268 = vmatpush.bf16.msra.mxu1 %v897_v4  ;;  %v894_v7 = vld [vmem:[#allocation7 + $0x20] sm:$0xff]  ;;  %v893_v8 = vld [vmem:[#allocation7 + $0x18] sm:$0xff]  ;;  %s688_s26 = sshll.u32 %s1195_s22, 4  ;;  %s689_s26 = int_to_ptr.vmem [resolvable:$true] %s688_s26 }
  0x25   :  { %v892_v9 = vld [vmem:[#allocation7 + $0x10] sm:$0xff]  ;;  %v891_v10 = vld [vmem:[#allocation7 + $0x8] sm:$0xff]  ;;  %v890_v11 = vld [vmem:[#allocation7] sm:$0xff] }
  0x26   :  { %728 = vmatmul.msk.bf16.vlgmr.msra.gmra.mxu0 %vm179_vm0, %v168_v3  ;;  %v905_v12 = vld [vmem:[#allocation8 + $0x38] sm:$0xff]  ;;  %v904_v13 = vld [vmem:[#allocation8 + $0x30] sm:$0xff]  ;;  %v903_v14 = vld [vmem:[#allocation8 + $0x28] sm:$0xff] }
  0x27   :  { %353 = vmatpush.bf16.msra.mxu2 %v905_v12  ;;  %v902_v15 = vld [vmem:[#allocation8 + $0x20] sm:$0xff]  ;;  %v943_v17 = vld [vmem:[%s1373_s2] ss:$0 sm:$0xff]  ;;  %v901_v24 = vld [vmem:[#allocation8 + $0x18] sm:$0xff] }
  0x28   :  { %269 = vmatpush.bf16.msra.mxu1 %v896_v5  ;;  %v900_v25 = vld [vmem:[#allocation8 + $0x10] sm:$0xff]  ;;  %v899_v26 = vld [vmem:[#allocation8 + $0x8] sm:$0xff]  ;;  %v898_v27 = vld [vmem:[#allocation8] sm:$0xff] }
  0x29   :  { %v944_v29 = vld [vmem:[%s1375_s4] ss:$0 sm:$0xff]  ;;  %v913_v45 = vld [vmem:[#allocation10 + $0x38] sm:$0xff]  ;;  %v912_v46 = vld [vmem:[#allocation10 + $0x30] sm:$0xff] }
  0x2a   :  { %v945_v36 = vld [vmem:[%s1377_s6] ss:$0 sm:$0xff]  ;;  %498 = vmatpush.bf16.msra.mxu3 %v913_v45  ;;  %v910_v48 = vld [vmem:[#allocation10 + $0x20] sm:$0xff]  ;;  %v909_v49 = vld [vmem:[#allocation10 + $0x18] sm:$0xff] }
  0x2b   :  { %354 = vmatpush.bf16.msra.mxu2 %v904_v13  ;;  %v911_v47 = vld [vmem:[#allocation10 + $0x28] sm:$0xff]  ;;  %v908_v52 = vld [vmem:[#allocation10 + $0x10] sm:$0xff]  ;;  %v906_v59 = vld [vmem:[#allocation10] sm:$0xff] }
  0x2c   :  { %270 = vmatpush.bf16.msra.mxu1 %v895_v6  ;;  %v907_v56 = vld [vmem:[#allocation10 + $0x8] sm:$0xff]  ;;  %v921_v3 = vld [vmem:[#allocation11 + $0x38] sm:$0xff]  ;;  %v920_v5 = vld [vmem:[#allocation11 + $0x30] sm:$0xff] }
  0x2d   :  { %583 = vmatpush.bf16.msrb.mxu0 %v921_v3  ;;  %v918_v13 = vld [vmem:[#allocation11 + $0x20] sm:$0xff] }
  0x2e   :  { %499 = vmatpush.bf16.msra.mxu3 %v912_v46 }
  0x2f   :  { %355 = vmatpush.bf16.msra.mxu2 %v903_v14 }
  0x30   :  { %271 = vmatpush.bf16.msra.mxu1 %v894_v7 }
  0x31   :  { %584 = vmatpush.bf16.msrb.mxu0 %v920_v5 }
  0x32   :  { %500 = vmatpush.bf16.msra.mxu3 %v911_v47 }
  0x33   :  { %356 = vmatpush.bf16.msra.mxu2 %v902_v15 }
  0x34   :  { %272 = vmatpush.bf16.msra.mxu1 %v893_v8 }
  0x36   :  { %501 = vmatpush.bf16.msra.mxu3 %v910_v48 }
  0x37   :  { %357 = vmatpush.bf16.msra.mxu2 %v901_v24 }
  0x38   :  { %273 = vmatpush.bf16.msra.mxu1 %v892_v9 }
  0x3a   :  { %502 = vmatpush.bf16.msra.mxu3 %v909_v49 }
  0x3b   :  { %358 = vmatpush.bf16.msra.mxu2 %v900_v25 }
  0x3c   :  { %274 = vmatpush.bf16.msra.mxu1 %v891_v10  ;;  %v919_v10 = vld [vmem:[#allocation11 + $0x28] sm:$0xff] }
  0x3d   :  { %585 = vmatpush.bf16.msrb.mxu0 %v919_v10 }
  0x3e   :  { %503 = vmatpush.bf16.msra.mxu3 %v908_v52  ;;  %v923_v52 = vld [vmem:[#allocation13 + $0x8] sm:$0xff] }
  0x3f   :  { %359 = vmatpush.bf16.msra.mxu2 %v899_v26 }
  0x40   :  { %275 = vmatpush.bf16.msra.mxu1 %v890_v11 }
  0x41   :  { %586 = vmatpush.bf16.msrb.mxu0 %v918_v13 }
  0x42   :  { %504 = vmatpush.bf16.msra.mxu3 %v907_v56 }
  0x43   :  { %360 = vmatpush.bf16.msra.mxu2 %v898_v27 }
  0x46   :  { %505 = vmatpush.bf16.msra.mxu3 %v906_v59 }
  0xa3   :  { %v192_v16 = vpop.f32.mrf.mxu0 }
  0xa4   :  { %v193_v18 = vadd.f32 %v943_v17, %v192_v16 }
  0xa6   :  { %v197_v21 = vmax.f32 %v193_v18, 0.0  ;;  %v946_v18 = vld [vmem:[%s1384_s13] ss:$0 sm:$0xff] }
  0xab   :  { %v194_v19 = vpop.f32.mrf.mxu0 }
  0xac   :  { %v195_v20 = vadd.f32 %v943_v17, %v194_v19 }
  0xae   :  { %v198_v22 = vmax.f32 %v195_v20, 0.0 }
  0xb0   :  { %v215_v23 = vpack.c.bf16 %v198_v22, %v197_v21  ;;  %v947_v22 = vld [vmem:[%s1385_s14] ss:$0 sm:$0xff] }
  0xb2   :  { %276 = vmatmul.bf16.vlgmr.msra.gmra.mxu1 %v215_v23 }
 0x12f   :  { %v277_v28 = vpop.f32.mrf.mxu1 }
 0x130   :  { %v278_v30 = vadd.f32 %v944_v29, %v277_v28 }
 0x132   :  { %v282_v33 = vmax.f32 %v278_v30, 0.0 }
 0x137   :  { %v279_v31 = vpop.f32.mrf.mxu1 }
 0x138   :  { %v280_v32 = vadd.f32 %v944_v29, %v279_v31 }
 0x13a   :  { %v283_v34 = vmax.f32 %v280_v32, 0.0 }
 0x13c   :  { %v300_v35 = vpack.c.bf16 %v283_v34, %v282_v33  ;;  %v917_v34 = vld [vmem:[#allocation11 + $0x18] sm:$0xff] }
 0x13d   :  { %587 = vmatpush.bf16.msrb.mxu0 %v917_v34 }
 0x13e   :  { %361 = vmatmul.bf16.vlgmr.msra.gmra.mxu2 %v300_v35  ;;  %v916_v35 = vld [vmem:[#allocation11 + $0x10] sm:$0xff] }
 0x141   :  { %588 = vmatpush.bf16.msrb.mxu0 %v916_v35 }
 0x1c1   :  { %v362_v37 = vpop.f32.mrf.mxu2 }
 0x1c2   :  { %v363_v38 = vadd.f32 %v945_v36, %v362_v37  ;;  %v914_v37 = vld [vmem:[#allocation11] sm:$0xff] }
 0x1c4   :  { %v1332_v39 = vmax.f32 %v363_v38, 0.0  ;;  %v929_v38 = vld [vmem:[#allocation13 + $0x38] sm:$0xff] }
 0x1c5   :  { %668 = vmatpush.bf16.msrb.mxu1 %v929_v38 }
 0x1c6   :  { %369 = vadd.xlane.f32.xlu0 %v1332_v39  ;;  %v373_v40 = vmul.f32 %v1332_v39, %v1332_v39 }
 0x1c8   :  { %375 = vadd.xlane.f32.xlu1 %v373_v40  ;;  %v927_v40 = vld [vmem:[#allocation13 + $0x28] sm:$0xff] }
 0x1c9   :  { %v364_v41 = vpop.f32.mrf.mxu2 }
 0x1ca   :  { %v365_v42 = vadd.f32 %v945_v36, %v364_v41  ;;  %v915_v36 = vld [vmem:[#allocation11 + $0x8] sm:$0xff]  ;;  %v926_v41 = vld [vmem:[#allocation13 + $0x20] sm:$0xff] }
 0x1cb   :  { %589 = vmatpush.bf16.msrb.mxu0 %v915_v36 }
 0x1cc   :  { %v1337_v43 = vmax.f32 %v365_v42, 0.0 }
 0x1ce   :  { %371 = vadd.xlane.f32.xlu0 %v1337_v43  ;;  %v374_v44 = vmul.f32 %v1337_v43, %v1337_v43 }
 0x1cf   :  { %590 = vmatpush.bf16.msrb.mxu0 %v914_v37 }
 0x1d0   :  { %377 = vadd.xlane.f32.xlu1 %v374_v44 }
 0x239   :  { %v370_v50 = vpop.xlane.xlu0 %369 }
 0x23a   :  { %v379_v51 = vmul.f32 0.0625, %v370_v50  ;;  %v925_v50 = vld [vmem:[#allocation13 + $0x18] sm:$0xff] }
 0x23b   :  { %v376_v53 = vpop.xlane.xlu1 %375 }
 0x23c   :  { %v383_v54 = vmul.f32 %v379_v51, %v379_v51  ;;  %v381_v55 = vmul.f32 0.0625, %v376_v53  ;;  %v389_v16 = vsub.f32 %v1332_v39, %v379_v51  ;;  %v928_v39 = vld [vmem:[#allocation13 + $0x30] sm:$0xff]  ;;  %v922_v53 = vld [vmem:[#allocation13] sm:$0xff] }
 0x23d   :  { %669 = vmatpush.bf16.msrb.mxu1 %v928_v39  ;;  %v924_v51 = vld [vmem:[#allocation13 + $0x10] sm:$0xff] }
 0x23e   :  { %v385_v57 = vsub.f32 %v381_v55, %v383_v54  ;;  %v949_v55 = vld [vmem:[%s1381_s10] ss:$0 sm:$0xff] }
 0x240   :  { %v387_v58 = vmax.f32 %v385_v57, 0.0 }
 0x241   :  { %v372_v60 = vpop.xlane.xlu0 %371  ;;  %670 = vmatpush.bf16.msrb.mxu1 %v927_v40 }
 0x242   :  { %v391_v61 = vadd.f32 1e-05, %v387_v58  ;;  %v380_v62 = vmul.f32 0.0625, %v372_v60 }
 0x243   :  { %v378_v63 = vpop.xlane.xlu1 %377 }
 0x244   :  { %951 = vrsqrt.f32 %v391_v61  ;;  %v384_v0 = vmul.f32 %v380_v62, %v380_v62  ;;  %v382_v1 = vmul.f32 0.0625, %v378_v63  ;;  %vm399_vm2 = vweird.f32 %v391_v61 }
 0x245   :  { %v390_v28 = vsub.f32 %v1337_v43, %v380_v62  ;;  %671 = vmatpush.bf16.msrb.mxu1 %v926_v41  ;;  %v948_v43 = vld [vmem:[%s1379_s8] ss:$0 sm:$0xff]  ;;  %s1194_s8 = smov [#allocation15]  }
 0x246   :  { %v386_v2 = vsub.f32 %v382_v1, %v384_v0  ;;  %s701_s5 = sshll.u32 %s1194_s8, 4  ;;  %v950_v62 = vld [vmem:[%s1383_s12] ss:$0 sm:$0xff]  ;;  %s702_s5 = int_to_ptr.vmem [resolvable:$true] %s701_s5 }
 0x248   :  { %v388_v4 = vmax.f32 %v386_v2, 0.0 }
 0x249   :  { %672 = vmatpush.bf16.msrb.mxu1 %v925_v50 }
 0x24a   :  { %v952_v6 = vpop.eup %951  ;;  %v392_v8 = vadd.f32 1e-05, %v388_v4 }
 0x24b   :  { %v394_v7 = vmul.f32 %v952_v6, %v391_v61  ;;  %vm400_vm1 = vweird.f32 %v952_v6 }
 0x24c   :  { %953 = vrsqrt.f32 %v392_v8  ;;  %vm401_vm3 = vmor %vm399_vm2, %vm400_vm1  ;;  %vm409_vm5 = vweird.f32 %v392_v8 }
 0x24d   :  { %v395_v9 = vmul.f32 %v952_v6, %v394_v7  ;;  %673 = vmatpush.bf16.msrb.mxu1 %v924_v51 }
 0x24f   :  { %v396_v11 = vmul.f32 0.5, %v395_v9 }
 0x251   :  { %v397_v12 = vsub.f32 1.5, %v396_v11  ;;  %674 = vmatpush.bf16.msrb.mxu1 %v923_v52 }
 0x252   :  { %v954_v14 = vpop.eup %953 }
 0x253   :  { %v398_v15 = vmul.f32 %v952_v6, %v397_v12  ;;  %v404_v17 = vmul.f32 %v954_v14, %v392_v8  ;;  %vm410_vm4 = vweird.f32 %v954_v14 }
 0x254   :  { %vm411_vm6 = vmor %vm409_vm5, %vm410_vm4 }
 0x255   :  { %v402_v19 = vsel %vm401_vm3, %v952_v6, %v398_v15  ;;  %v405_v20 = vmul.f32 %v954_v14, %v404_v17  ;;  %675 = vmatpush.bf16.msrb.mxu1 %v922_v53 }
 0x256   :  { %v413_v21 = vmul.f32 %v402_v19, %v389_v16 }
 0x257   :  { %v406_v23 = vmul.f32 0.5, %v405_v20 }
 0x258   :  { %v419_v24 = vmul.f32 %v946_v18, %v413_v21 }
 0x259   :  { %v407_v25 = vsub.f32 1.5, %v406_v23 }
 0x25a   :  { %v425_v26 = vadd.f32 %v947_v22, %v419_v24 }
 0x25b   :  { %v408_v27 = vmul.f32 %v954_v14, %v407_v25 }
 0x25c   :  { %427 = vst [vmem:[#allocation15] sm:$0xff] %v425_v26 }
 0x25d   :  { %v412_v29 = vsel %vm411_vm6, %v954_v14, %v408_v27 }
 0x25e   :  { %v414_v30 = vmul.f32 %v412_v29, %v390_v28 }
 0x260   :  { %v420_v31 = vmul.f32 %v946_v18, %v414_v30 }
 0x262   :  { %v426_v32 = vadd.f32 %v947_v22, %v420_v31 }
 0x264   :  { %428 = vst [vmem:[#allocation15 + $0x8] sm:$0xff] %v426_v32  ;;  %v445_v33 = vpack.c.bf16 %v426_v32, %v425_v26 }
 0x265   :  { %709 = dma.vmem_to_hbm [thread:$0]  %s702_s5, 256, %s704_s21, [#allocation16], %s1189_s25, %s1189_s25, %s1190_s27  }
 0x266   :  { %506 = vmatmul.bf16.vlgmr.msra.gmra.mxu3 %v445_v33 }
 0x2e9   :  { %v507_v42 = vpop.f32.mrf.mxu3 }
 0x2ea   :  { %v508_v44 = vadd.f32 %v948_v43, %v507_v42 }
 0x2ec   :  { %v512_v47 = vmax.f32 %v508_v44, 0.0 }
 0x2f1   :  { %v509_v45 = vpop.f32.mrf.mxu3 }
 0x2f2   :  { %v510_v46 = vadd.f32 %v948_v43, %v509_v45 }
 0x2f4   :  { %v513_v48 = vmax.f32 %v510_v46, 0.0 }
 0x2f6   :  { %v530_v49 = vpack.c.bf16 %v513_v48, %v512_v47 }
 0x2f8   :  { %591 = vmatmul.bf16.vlgmr.msrb.gmra.mxu0 %v530_v49 }
 0x375   :  { %v592_v54 = vpop.f32.mrf.mxu0 }
 0x376   :  { %v593_v56 = vadd.f32 %v949_v55, %v592_v54 }
 0x378   :  { %v597_v59 = vmax.f32 %v593_v56, 0.0 }
 0x37d   :  { %v594_v57 = vpop.f32.mrf.mxu0 }
 0x37e   :  { %v595_v58 = vadd.f32 %v949_v55, %v594_v57 }
 0x380   :  { %v598_v60 = vmax.f32 %v595_v58, 0.0 }
 0x382   :  { %v615_v61 = vpack.c.bf16 %v598_v60, %v597_v59 }
 0x384   :  { %676 = vmatmul.bf16.vlgmr.msrb.gmra.mxu1 %v615_v61 }
 0x401   :  { %v677_v63 = vpop.f32.mrf.mxu1 }
 0x402   :  { %v678_v0 = vadd.f32 %v950_v62, %v677_v63 }
 0x404   :  { %682 = vst [vmem:[#allocation14] sm:$0xff] %v678_v0 }
 0x409   :  { %v679_v1 = vpop.f32.mrf.mxu1 }
 0x40a   :  { %v680_v2 = vadd.f32 %v950_v62, %v679_v1 }
 0x40c   :  { %683 = vst [vmem:[#allocation14 + $0x8] sm:$0xff] %v680_v2 }
 0x40d   :  { %696 = dma.vmem_to_hbm [thread:$0]  %s689_s26, 256, %s691_s9, [#allocation4], %s1189_s25, %s1189_s25, %s1190_s27  }
 0x40e   :  { %1179 = dma.done.wait [#allocation4], 256  }
 0x40f   :  { %1180 = vsyncadd [#allocation4], 4294967040 }
 0x410   :  { %1181 = dma.done.wait [#allocation16], 256  }
 0x411   :  { %1182 = vsyncadd [#allocation16], 4294967040 }
 0x412   :  { %718 = vsyncpa [#allocation3], 1 }
 0x413   :  { %719 = vsyncpa [#allocation6], 1 }
 0x414   :  { %720 = vsyncpa [#allocation9], 1 }
 0x415   :  { %721 = vsyncpa [#allocation12], 1 }
 0x416   :  { %722 = vsyncpa [#allocation4], 1 }
 0x417   :  { %723 = vsyncpa [#allocation16], 1 }

</bundles_post_ra>
